<compile_context>
chip_gen: v7x
topology: tpu7x:2x2x1
jax: 0.10.0
libtpu: 0.0.40
codegen_flags: <defaults>
</compile_context>

<pallas_src>
import jax
import jax.numpy as jnp
from jax.experimental import pallas as pl
from jax.experimental.pallas import tpu as pltpu


def _make_kernel(spatial_w):
    """Kernel factory: spatial width is needed statically for the tap shifts."""

    def diffusion_kernel(emb_ref, x_ref, masks_ref,
                         wa1, ba1, wa2, ba2, wa3, ba3,
                         wb1, bb1, wb2, bb2, wb3, bb3,
                         wf, bf_,
                         out_ref, patch_ref):
        W = spatial_w
        HW = x_ref.shape[-1]
        Cr = patch_ref.shape[0] // 9

        # feat = noisy_image + time_embedding(t)[..., None, None]
        feat = x_ref[0] + emb_ref[0]                       # (C, HW) + (C, 1)

        def matmul(w_ref, act):
            # bf16 MXU matmul, f32 accumulation (BN scale folded into w).
            return jnp.dot(w_ref[...], act.astype(w_ref.dtype),
                           preferred_element_type=jnp.float32)

        def conv3x3(h, w_ref):
            # 3x3 conv (padding=1) as ONE im2col matmul in channel-major layout.
            # Each tap = lane roll of the (Cr, HW) activation by (dy*W + dx),
            # boundary-masked, stored as an aligned (Cr, HW) slab into the
            # transposed bf16 patch (9*Cr, HW).
            k = 0
            for dy in (-1, 0, 1):
                for dx in (-1, 0, 1):
                    s = dy * W + dx
                    if s == 0:
                        tap = h
                    else:
                        tap = (pltpu.roll(h, shift=(-s) % HW, axis=1)
                               * masks_ref[k * Cr:(k + 1) * Cr, :])
                    patch_ref[k * Cr:(k + 1) * Cr, :] = tap.astype(patch_ref.dtype)
                    k += 1
            return jnp.dot(w_ref[...], patch_ref[...],
                           preferred_element_type=jnp.float32)

        def bottleneck(f, w1, b1, w2, b2, w3, b3):
            h1 = jnp.maximum(matmul(w1, f) + b1[...], 0.0)     # 1x1 conv+BN, ReLU
            h2 = jnp.maximum(conv3x3(h1, w2) + b2[...], 0.0)   # 3x3 conv+BN, ReLU
            h3 = matmul(w3, h2) + b3[...]                      # 1x1 conv+BN
            return h3 + f                                      # residual, no ReLU

        f1 = bottleneck(feat, wa1, ba1, wa2, ba2, wa3, ba3)
        f2 = bottleneck(f1, wb1, bb1, wb2, bb2, wb3, bb3)
        out_ref[0] = matmul(wf, f2) + bf_[...]                 # final 1x1 conv+BN

    return diffusion_kernel


def _make_tap_masks(H, W, Cr):
    """(9*Cr, H*W) f32 validity masks for the 9 padded-conv taps."""
    n = jnp.arange(H * W, dtype=jnp.int32)
    y, x = n // W, n % W
    rows = []
    for dy in (-1, 0, 1):
        for dx in (-1, 0, 1):
            valid = ((y + dy >= 0) & (y + dy < H) & (x + dx >= 0) & (x + dx < W))
            rows.append(jnp.broadcast_to(valid.astype(jnp.float32)[None, :],
                                         (Cr, H * W)))
    return jnp.concatenate(rows, axis=0)


def init_params(channels_in, reduction=4, seed=0, eps=1e-5, mxu_dtype=jnp.bfloat16):
    """Random params in PyTorch layout (OIHW conv weights); BN (eval mode,
    running stats) folded exactly into per-output-channel scale (into weights)
    and shift.  Returns f32 OIHW params for the reference and packed
    channel-major bf16 params for the kernel."""
    C = channels_in
    Cr = C // reduction
    keys = iter(jax.random.split(jax.random.PRNGKey(seed), 64))

    def nrm(shape, scale=0.1):
        return scale * jax.random.normal(next(keys), shape, jnp.float32)

    def conv_bn(cin, cout, ksize):
        w = nrm((cout, cin, ksize, ksize), 0.2)           # OIHW, like PyTorch
        bias = nrm((cout,), 0.1)
        gamma = 1.0 + nrm((cout,), 0.1)
        beta = nrm((cout,), 0.1)
        mean = nrm((cout,), 0.1)
        var = 1.0 + jnp.abs(nrm((cout,), 0.1))
        scale = gamma / jnp.sqrt(var + eps)
        w_folded = w * scale[:, None, None, None]         # fold BN scale
        shift = beta + scale * (bias - mean)               # fused conv-bias + BN shift
        return w_folded, shift

    convs = []
    for _ in range(2):                                     # two Bottleneck blocks
        convs.append(conv_bn(C, Cr, 1))
        convs.append(conv_bn(Cr, Cr, 3))
        convs.append(conv_bn(Cr, C, 1))
    convs.append(conv_bn(C, C, 1))                         # final 1x1 conv + BN

    emb_table = nrm((1280, C), 0.5)                        # nn.Embedding(1280, C)

    # Pack for the kernel: OIHW -> (Cout, Cin) for 1x1, (Cout, 9*Cin) (tap-major,
    # cin-minor, tap order = (dy,dx) row-major) for 3x3; shifts as (Cout, 1).
    kparams = []
    for w, shift in convs:
        cout, cin, k, _ = w.shape
        if k == 1:
            wm = w.reshape(cout, cin)
        else:
            wm = jnp.transpose(w, (0, 2, 3, 1)).reshape(cout, k * k * cin)
        kparams.append(wm.astype(mxu_dtype))
        kparams.append(shift.reshape(cout, 1).astype(jnp.float32))
    return emb_table, convs, kparams, Cr


def diffusion_forward(x_nchw, t, emb_table, kernel_params, Cr):
    B, C, H, W = x_nchw.shape
    HW = H * W
    # NCHW -> channel-major (B, C, H*W): pure reshape, no HBM transpose pass.
    x = x_nchw.astype(jnp.float32).reshape(B, C, HW)
    # TODO(synk): the embedding gather stays in the JAX wrapper (no clean in-kernel gather needed here).
    emb = jnp.take(emb_table, t.astype(jnp.int32), axis=0).reshape(B, C, 1)
    masks = _make_tap_masks(H, W, Cr)

    const2d = lambda b: (0, 0)
    in_specs = [pl.BlockSpec((1, C, 1), lambda b: (b, 0, 0)),     # emb
                pl.BlockSpec((1, C, HW), lambda b: (b, 0, 0)),    # x
                pl.BlockSpec(masks.shape, const2d)]               # tap masks
    in_specs += [pl.BlockSpec(p.shape, const2d) for p in kernel_params]

    out = pl.pallas_call(
        _make_kernel(W),
        out_shape=jax.ShapeDtypeStruct((B, C, HW), jnp.float32),
        grid=(B,),
        in_specs=in_specs,
        out_specs=pl.BlockSpec((1, C, HW), lambda b: (b, 0, 0)),
        scratch_shapes=[pltpu.VMEM((9 * Cr, HW), jnp.bfloat16)],   # im2col patch
        compiler_params=pltpu.CompilerParams(
            dimension_semantics=("parallel",)),
    )(emb, x, masks, *kernel_params)

    return out.reshape(B, C, H, W)                                 # free reshape back


def reference_forward(x, t, emb_table, convs):
    """Pure-JAX f32 reference (eval-mode BN folded identically), NCHW/OIHW."""
    feat = x + jnp.take(emb_table, t.astype(jnp.int32), axis=0)[:, :, None, None]

    def conv(h, params):
        w, shift = params
        p = (w.shape[-1] - 1) // 2
        out = jax.lax.conv_general_dilated(
            h, w, (1, 1), ((p, p), (p, p)),
            dimension_numbers=('NCHW', 'OIHW', 'NCHW'))
        return out + shift[None, :, None, None]

    def bottleneck(f, c1, c2, c3):
        h = jnp.maximum(conv(f, c1), 0.0)
        h = jnp.maximum(conv(h, c2), 0.0)
        h = conv(h, c3)
        return h + f                          # Bottleneck.forward: no ReLU after add

    f1 = bottleneck(feat, convs[0], convs[1], convs[2])
    f2 = bottleneck(f1, convs[3], convs[4], convs[5])
    return conv(f2, convs[6])


if __name__ == "__main__":
    B, C, H, W = 2, 32, 16, 16      # channels_in=32 (divisible by reduction=4)

    emb_table, convs_f32, kernel_params, Cr = init_params(C, reduction=4, seed=0)

    key = jax.random.PRNGKey(0)
    kx, kt = jax.random.split(key)
    x = jax.random.normal(kx, (B, C, H, W), jnp.float32)       # NCHW, like PyTorch
    t = jax.random.randint(kt, (B,), 0, 1280)                  # timestep indices

    out = diffusion_forward(x, t, emb_table, kernel_params, Cr)
    out = jax.block_until_ready(out)

    ref = reference_forward(x, t, emb_table, convs_f32)
    rel_err = float(jnp.max(jnp.abs(out - ref)) / (jnp.max(jnp.abs(ref)) + 1e-6))

    assert out.shape == (B, C, H, W) and out.dtype == jnp.float32
    assert rel_err < 0.08, f"mismatch vs f32 reference: rel-err={rel_err}"
    print("KERNEL_OK")
</pallas_src>

<mosaic_0001>
module attributes {stable_mosaic.version = 11 : i64} {
  func.func @diffusion_kernel(%arg0: i32, %arg1: memref<1x32x1xf32, #tpu.memory_space<vmem>>, %arg2: memref<1x32x256xf32, #tpu.memory_space<vmem>>, %arg3: memref<72x256xf32, #tpu.memory_space<vmem>>, %arg4: memref<8x32xbf16, #tpu.memory_space<vmem>>, %arg5: memref<8x1xf32, #tpu.memory_space<vmem>>, %arg6: memref<8x72xbf16, #tpu.memory_space<vmem>>, %arg7: memref<8x1xf32, #tpu.memory_space<vmem>>, %arg8: memref<32x8xbf16, #tpu.memory_space<vmem>>, %arg9: memref<32x1xf32, #tpu.memory_space<vmem>>, %arg10: memref<8x32xbf16, #tpu.memory_space<vmem>>, %arg11: memref<8x1xf32, #tpu.memory_space<vmem>>, %arg12: memref<8x72xbf16, #tpu.memory_space<vmem>>, %arg13: memref<8x1xf32, #tpu.memory_space<vmem>>, %arg14: memref<32x8xbf16, #tpu.memory_space<vmem>>, %arg15: memref<32x1xf32, #tpu.memory_space<vmem>>, %arg16: memref<32x32xbf16, #tpu.memory_space<vmem>>, %arg17: memref<32x1xf32, #tpu.memory_space<vmem>>, %arg18: memref<1x32x256xf32, #tpu.memory_space<vmem>>, %arg19: memref<72x256xbf16, #tpu.memory_space<vmem>>) attributes {dimension_semantics = [#tpu.dimension_semantics<parallel>], iteration_bounds = array<i64: 2>, scalar_prefetch = 0 : i64, scratch_operands = 1 : i64, tpu.core_type = #tpu.core_type<tc>, window_params = [{transform_indices = @transform_0, window_bounds = array<i64: 1, 32, 1>}, {transform_indices = @transform_1, window_bounds = array<i64: 1, 32, 256>}, {pipeline_mode = #tpu.pipeline_mode<synchronous>, transform_indices = @transform_2, window_bounds = array<i64: 72, 256>}, {pipeline_mode = #tpu.pipeline_mode<synchronous>, transform_indices = @transform_3, window_bounds = array<i64: 8, 32>}, {pipeline_mode = #tpu.pipeline_mode<synchronous>, transform_indices = @transform_4, window_bounds = array<i64: 8, 1>}, {pipeline_mode = #tpu.pipeline_mode<synchronous>, transform_indices = @transform_5, window_bounds = array<i64: 8, 72>}, {pipeline_mode = #tpu.pipeline_mode<synchronous>, transform_indices = @transform_6, window_bounds = array<i64: 8, 1>}, {pipeline_mode = #tpu.pipeline_mode<synchronous>, transform_indices = @transform_7, window_bounds = array<i64: 32, 8>}, {pipeline_mode = #tpu.pipeline_mode<synchronous>, transform_indices = @transform_8, window_bounds = array<i64: 32, 1>}, {pipeline_mode = #tpu.pipeline_mode<synchronous>, transform_indices = @transform_9, window_bounds = array<i64: 8, 32>}, {pipeline_mode = #tpu.pipeline_mode<synchronous>, transform_indices = @transform_10, window_bounds = array<i64: 8, 1>}, {pipeline_mode = #tpu.pipeline_mode<synchronous>, transform_indices = @transform_11, window_bounds = array<i64: 8, 72>}, {pipeline_mode = #tpu.pipeline_mode<synchronous>, transform_indices = @transform_12, window_bounds = array<i64: 8, 1>}, {pipeline_mode = #tpu.pipeline_mode<synchronous>, transform_indices = @transform_13, window_bounds = array<i64: 32, 8>}, {pipeline_mode = #tpu.pipeline_mode<synchronous>, transform_indices = @transform_14, window_bounds = array<i64: 32, 1>}, {pipeline_mode = #tpu.pipeline_mode<synchronous>, transform_indices = @transform_15, window_bounds = array<i64: 32, 32>}, {pipeline_mode = #tpu.pipeline_mode<synchronous>, transform_indices = @transform_16, window_bounds = array<i64: 32, 1>}, {transform_indices = @transform_17, window_bounds = array<i64: 1, 32, 256>}]} {
    %c0 = arith.constant 0 : index
    %c0_0 = arith.constant 0 : index
    %c0_1 = arith.constant 0 : index
    %0 = vector.load %arg2[%c0, %c0_0, %c0_1] : memref<1x32x256xf32, #tpu.memory_space<vmem>>, vector<1x32x256xf32>
    %1 = vector.shape_cast %0 : vector<1x32x256xf32> to vector<32x256xf32>
    %c0_2 = arith.constant 0 : index
    %c0_3 = arith.constant 0 : index
    %c0_4 = arith.constant 0 : index
    %2 = vector.load %arg1[%c0_2, %c0_3, %c0_4] : memref<1x32x1xf32, #tpu.memory_space<vmem>>, vector<1x32x1xf32>
    %3 = vector.shape_cast %2 : vector<1x32x1xf32> to vector<32x1xf32>
    %4 = vector.broadcast %3 : vector<32x1xf32> to vector<32x256xf32>
    %5 = arith.addf %1, %4 : vector<32x256xf32>
    %c0_5 = arith.constant 0 : index
    %c0_6 = arith.constant 0 : index
    %6 = vector.load %arg4[%c0_5, %c0_6] : memref<8x32xbf16, #tpu.memory_space<vmem>>, vector<8x32xbf16>
    %7 = arith.truncf %5 : vector<32x256xf32> to vector<32x256xbf16>
    %cst = arith.constant dense<0.000000e+00> : vector<8x256xf32>
    %8 = tpu.matmul %6, %7, %cst {dimension_numbers = #tpu.dot_dimension_numbers<[1], [0], [0], [1], [0, 0, 1, 1], [], []>} : vector<8x32xbf16>, vector<32x256xbf16>, vector<8x256xf32> -> vector<8x256xf32>
    %c0_7 = arith.constant 0 : index
    %c0_8 = arith.constant 0 : index
    %9 = vector.load %arg5[%c0_7, %c0_8] : memref<8x1xf32, #tpu.memory_space<vmem>>, vector<8x1xf32>
    %10 = vector.broadcast %9 : vector<8x1xf32> to vector<8x256xf32>
    %11 = arith.addf %8, %10 : vector<8x256xf32>
    %cst_9 = arith.constant 0.000000e+00 : f32
    %12 = vector.broadcast %cst_9 : f32 to vector<8x256xf32>
    %13 = arith.maximumf %11, %12 : vector<8x256xf32>
    %c17_i32 = arith.constant 17 : i32
    %14 = tpu.dynamic_rotate %13 by %c17_i32 dim 1 : vector<8x256xf32>, i32 -> vector<8x256xf32>
    %c0_10 = arith.constant 0 : index
    %c0_11 = arith.constant 0 : index
    %15 = vector.load %arg3[%c0_10, %c0_11] : memref<72x256xf32, #tpu.memory_space<vmem>>, vector<8x256xf32>
    %16 = arith.mulf %14, %15 : vector<8x256xf32>
    %17 = arith.truncf %16 : vector<8x256xf32> to vector<8x256xbf16>
    %c0_12 = arith.constant 0 : index
    %c0_13 = arith.constant 0 : index
    %18 = vector.load %arg19[%c0_12, %c0_13] : memref<72x256xbf16, #tpu.memory_space<vmem>>, vector<8x256xbf16>
    tpu.vector_store %arg19[%c0_12, %c0_13], %17 {strides = array<i32>} : memref<72x256xbf16, #tpu.memory_space<vmem>>, vector<8x256xbf16>,
    %c16_i32 = arith.constant 16 : i32
    %19 = tpu.dynamic_rotate %13 by %c16_i32 dim 1 : vector<8x256xf32>, i32 -> vector<8x256xf32>
    %c8 = arith.constant 8 : index
    %c0_14 = arith.constant 0 : index
    %20 = vector.load %arg3[%c8, %c0_14] : memref<72x256xf32, #tpu.memory_space<vmem>>, vector<8x256xf32>
    %21 = arith.mulf %19, %20 : vector<8x256xf32>
    %22 = arith.truncf %21 : vector<8x256xf32> to vector<8x256xbf16>
    %c8_15 = arith.constant 8 : index
    %c0_16 = arith.constant 0 : index
    %23 = vector.load %arg19[%c8_15, %c0_16] : memref<72x256xbf16, #tpu.memory_space<vmem>>, vector<8x256xbf16>
    tpu.vector_store %arg19[%c8_15, %c0_16], %22 {strides = array<i32>} : memref<72x256xbf16, #tpu.memory_space<vmem>>, vector<8x256xbf16>,
    %c15_i32 = arith.constant 15 : i32
    %24 = tpu.dynamic_rotate %13 by %c15_i32 dim 1 : vector<8x256xf32>, i32 -> vector<8x256xf32>
    %c16 = arith.constant 16 : index
    %c0_17 = arith.constant 0 : index
    %25 = vector.load %arg3[%c16, %c0_17] : memref<72x256xf32, #tpu.memory_space<vmem>>, vector<8x256xf32>
    %26 = arith.mulf %24, %25 : vector<8x256xf32>
    %27 = arith.truncf %26 : vector<8x256xf32> to vector<8x256xbf16>
    %c16_18 = arith.constant 16 : index
    %c0_19 = arith.constant 0 : index
    %28 = vector.load %arg19[%c16_18, %c0_19] : memref<72x256xbf16, #tpu.memory_space<vmem>>, vector<8x256xbf16>
    tpu.vector_store %arg19[%c16_18, %c0_19], %27 {strides = array<i32>} : memref<72x256xbf16, #tpu.memory_space<vmem>>, vector<8x256xbf16>,
    %c1_i32 = arith.constant 1 : i32
    %29 = tpu.dynamic_rotate %13 by %c1_i32 dim 1 : vector<8x256xf32>, i32 -> vector<8x256xf32>
    %c24 = arith.constant 24 : index
    %c0_20 = arith.constant 0 : index
    %30 = vector.load %arg3[%c24, %c0_20] : memref<72x256xf32, #tpu.memory_space<vmem>>, vector<8x256xf32>
    %31 = arith.mulf %29, %30 : vector<8x256xf32>
    %32 = arith.truncf %31 : vector<8x256xf32> to vector<8x256xbf16>
    %c24_21 = arith.constant 24 : index
    %c0_22 = arith.constant 0 : index
    %33 = vector.load %arg19[%c24_21, %c0_22] : memref<72x256xbf16, #tpu.memory_space<vmem>>, vector<8x256xbf16>
    tpu.vector_store %arg19[%c24_21, %c0_22], %32 {strides = array<i32>} : memref<72x256xbf16, #tpu.memory_space<vmem>>, vector<8x256xbf16>,
    %34 = arith.truncf %13 : vector<8x256xf32> to vector<8x256xbf16>
    %c32 = arith.constant 32 : index
    %c0_23 = arith.constant 0 : index
    %35 = vector.load %arg19[%c32, %c0_23] : memref<72x256xbf16, #tpu.memory_space<vmem>>, vector<8x256xbf16>
    tpu.vector_store %arg19[%c32, %c0_23], %34 {strides = array<i32>} : memref<72x256xbf16, #tpu.memory_space<vmem>>, vector<8x256xbf16>,
    %c255_i32 = arith.constant 255 : i32
    %36 = tpu.dynamic_rotate %13 by %c255_i32 dim 1 : vector<8x256xf32>, i32 -> vector<8x256xf32>
    %c40 = arith.constant 40 : index
    %c0_24 = arith.constant 0 : index
    %37 = vector.load %arg3[%c40, %c0_24] : memref<72x256xf32, #tpu.memory_space<vmem>>, vector<8x256xf32>
    %38 = arith.mulf %36, %37 : vector<8x256xf32>
    %39 = arith.truncf %38 : vector<8x256xf32> to vector<8x256xbf16>
    %c40_25 = arith.constant 40 : index
    %c0_26 = arith.constant 0 : index
    %40 = vector.load %arg19[%c40_25, %c0_26] : memref<72x256xbf16, #tpu.memory_space<vmem>>, vector<8x256xbf16>
    tpu.vector_store %arg19[%c40_25, %c0_26], %39 {strides = array<i32>} : memref<72x256xbf16, #tpu.memory_space<vmem>>, vector<8x256xbf16>,
    %c241_i32 = arith.constant 241 : i32
    %41 = tpu.dynamic_rotate %13 by %c241_i32 dim 1 : vector<8x256xf32>, i32 -> vector<8x256xf32>
    %c48 = arith.constant 48 : index
    %c0_27 = arith.constant 0 : index
    %42 = vector.load %arg3[%c48, %c0_27] : memref<72x256xf32, #tpu.memory_space<vmem>>, vector<8x256xf32>
    %43 = arith.mulf %41, %42 : vector<8x256xf32>
    %44 = arith.truncf %43 : vector<8x256xf32> to vector<8x256xbf16>
    %c48_28 = arith.constant 48 : index
    %c0_29 = arith.constant 0 : index
    %45 = vector.load %arg19[%c48_28, %c0_29] : memref<72x256xbf16, #tpu.memory_space<vmem>>, vector<8x256xbf16>
    tpu.vector_store %arg19[%c48_28, %c0_29], %44 {strides = array<i32>} : memref<72x256xbf16, #tpu.memory_space<vmem>>, vector<8x256xbf16>,
    %c240_i32 = arith.constant 240 : i32
    %46 = tpu.dynamic_rotate %13 by %c240_i32 dim 1 : vector<8x256xf32>, i32 -> vector<8x256xf32>
    %c56 = arith.constant 56 : index
    %c0_30 = arith.constant 0 : index
    %47 = vector.load %arg3[%c56, %c0_30] : memref<72x256xf32, #tpu.memory_space<vmem>>, vector<8x256xf32>
    %48 = arith.mulf %46, %47 : vector<8x256xf32>
    %49 = arith.truncf %48 : vector<8x256xf32> to vector<8x256xbf16>
    %c56_31 = arith.constant 56 : index
    %c0_32 = arith.constant 0 : index
    %50 = vector.load %arg19[%c56_31, %c0_32] : memref<72x256xbf16, #tpu.memory_space<vmem>>, vector<8x256xbf16>
    tpu.vector_store %arg19[%c56_31, %c0_32], %49 {strides = array<i32>} : memref<72x256xbf16, #tpu.memory_space<vmem>>, vector<8x256xbf16>,
    %c239_i32 = arith.constant 239 : i32
    %51 = tpu.dynamic_rotate %13 by %c239_i32 dim 1 : vector<8x256xf32>, i32 -> vector<8x256xf32>
    %c64 = arith.constant 64 : index
    %c0_33 = arith.constant 0 : index
    %52 = vector.load %arg3[%c64, %c0_33] : memref<72x256xf32, #tpu.memory_space<vmem>>, vector<8x256xf32>
    %53 = arith.mulf %51, %52 : vector<8x256xf32>
    %54 = arith.truncf %53 : vector<8x256xf32> to vector<8x256xbf16>
    %c64_34 = arith.constant 64 : index
    %c0_35 = arith.constant 0 : index
    %55 = vector.load %arg19[%c64_34, %c0_35] : memref<72x256xbf16, #tpu.memory_space<vmem>>, vector<8x256xbf16>
    tpu.vector_store %arg19[%c64_34, %c0_35], %54 {strides = array<i32>} : memref<72x256xbf16, #tpu.memory_space<vmem>>, vector<8x256xbf16>,
    %c0_36 = arith.constant 0 : index
    %c0_37 = arith.constant 0 : index
    %56 = vector.load %arg6[%c0_36, %c0_37] : memref<8x72xbf16, #tpu.memory_space<vmem>>, vector<8x72xbf16>
    %c0_38 = arith.constant 0 : index
    %c0_39 = arith.constant 0 : index
    %57 = vector.load %arg19[%c0_38, %c0_39] : memref<72x256xbf16, #tpu.memory_space<vmem>>, vector<72x256xbf16>
    %cst_40 = arith.constant dense<0.000000e+00> : vector<8x256xf32>
    %58 = tpu.matmul %56, %57, %cst_40 {dimension_numbers = #tpu.dot_dimension_numbers<[1], [0], [0], [1], [0, 0, 1, 1], [], []>} : vector<8x72xbf16>, vector<72x256xbf16>, vector<8x256xf32> -> vector<8x256xf32>
    %c0_41 = arith.constant 0 : index
    %c0_42 = arith.constant 0 : index
    %59 = vector.load %arg7[%c0_41, %c0_42] : memref<8x1xf32, #tpu.memory_space<vmem>>, vector<8x1xf32>
    %60 = vector.broadcast %59 : vector<8x1xf32> to vector<8x256xf32>
    %61 = arith.addf %58, %60 : vector<8x256xf32>
    %cst_43 = arith.constant 0.000000e+00 : f32
    %62 = vector.broadcast %cst_43 : f32 to vector<8x256xf32>
    %63 = arith.maximumf %61, %62 : vector<8x256xf32>
    %c0_44 = arith.constant 0 : index
    %c0_45 = arith.constant 0 : index
    %64 = vector.load %arg8[%c0_44, %c0_45] : memref<32x8xbf16, #tpu.memory_space<vmem>>, vector<32x8xbf16>
    %65 = arith.truncf %63 : vector<8x256xf32> to vector<8x256xbf16>
    %cst_46 = arith.constant dense<0.000000e+00> : vector<32x256xf32>
    %66 = tpu.matmul %64, %65, %cst_46 {dimension_numbers = #tpu.dot_dimension_numbers<[1], [0], [0], [1], [0, 0, 1, 1], [], []>} : vector<32x8xbf16>, vector<8x256xbf16>, vector<32x256xf32> -> vector<32x256xf32>
    %c0_47 = arith.constant 0 : index
    %c0_48 = arith.constant 0 : index
    %67 = vector.load %arg9[%c0_47, %c0_48] : memref<32x1xf32, #tpu.memory_space<vmem>>, vector<32x1xf32>
    %68 = vector.broadcast %67 : vector<32x1xf32> to vector<32x256xf32>
    %69 = arith.addf %66, %68 : vector<32x256xf32>
    %70 = arith.addf %69, %5 : vector<32x256xf32>
    %c0_49 = arith.constant 0 : index
    %c0_50 = arith.constant 0 : index
    %71 = vector.load %arg10[%c0_49, %c0_50] : memref<8x32xbf16, #tpu.memory_space<vmem>>, vector<8x32xbf16>
    %72 = arith.truncf %70 : vector<32x256xf32> to vector<32x256xbf16>
    %cst_51 = arith.constant dense<0.000000e+00> : vector<8x256xf32>
    %73 = tpu.matmul %71, %72, %cst_51 {dimension_numbers = #tpu.dot_dimension_numbers<[1], [0], [0], [1], [0, 0, 1, 1], [], []>} : vector<8x32xbf16>, vector<32x256xbf16>, vector<8x256xf32> -> vector<8x256xf32>
    %c0_52 = arith.constant 0 : index
    %c0_53 = arith.constant 0 : index
    %74 = vector.load %arg11[%c0_52, %c0_53] : memref<8x1xf32, #tpu.memory_space<vmem>>, vector<8x1xf32>
    %75 = vector.broadcast %74 : vector<8x1xf32> to vector<8x256xf32>
    %76 = arith.addf %73, %75 : vector<8x256xf32>
    %cst_54 = arith.constant 0.000000e+00 : f32
    %77 = vector.broadcast %cst_54 : f32 to vector<8x256xf32>
    %78 = arith.maximumf %76, %77 : vector<8x256xf32>
    %c17_i32_55 = arith.constant 17 : i32
    %79 = tpu.dynamic_rotate %78 by %c17_i32_55 dim 1 : vector<8x256xf32>, i32 -> vector<8x256xf32>
    %c0_56 = arith.constant 0 : index
    %c0_57 = arith.constant 0 : index
    %80 = vector.load %arg3[%c0_56, %c0_57] : memref<72x256xf32, #tpu.memory_space<vmem>>, vector<8x256xf32>
    %81 = arith.mulf %79, %80 : vector<8x256xf32>
    %82 = arith.truncf %81 : vector<8x256xf32> to vector<8x256xbf16>
    %c0_58 = arith.constant 0 : index
    %c0_59 = arith.constant 0 : index
    %83 = vector.load %arg19[%c0_58, %c0_59] : memref<72x256xbf16, #tpu.memory_space<vmem>>, vector<8x256xbf16>
    tpu.vector_store %arg19[%c0_58, %c0_59], %82 {strides = array<i32>} : memref<72x256xbf16, #tpu.memory_space<vmem>>, vector<8x256xbf16>,
    %c16_i32_60 = arith.constant 16 : i32
    %84 = tpu.dynamic_rotate %78 by %c16_i32_60 dim 1 : vector<8x256xf32>, i32 -> vector<8x256xf32>
    %c8_61 = arith.constant 8 : index
    %c0_62 = arith.constant 0 : index
    %85 = vector.load %arg3[%c8_61, %c0_62] : memref<72x256xf32, #tpu.memory_space<vmem>>, vector<8x256xf32>
    %86 = arith.mulf %84, %85 : vector<8x256xf32>
    %87 = arith.truncf %86 : vector<8x256xf32> to vector<8x256xbf16>
    %c8_63 = arith.constant 8 : index
    %c0_64 = arith.constant 0 : index
    %88 = vector.load %arg19[%c8_63, %c0_64] : memref<72x256xbf16, #tpu.memory_space<vmem>>, vector<8x256xbf16>
    tpu.vector_store %arg19[%c8_63, %c0_64], %87 {strides = array<i32>} : memref<72x256xbf16, #tpu.memory_space<vmem>>, vector<8x256xbf16>,
    %c15_i32_65 = arith.constant 15 : i32
    %89 = tpu.dynamic_rotate %78 by %c15_i32_65 dim 1 : vector<8x256xf32>, i32 -> vector<8x256xf32>
    %c16_66 = arith.constant 16 : index
    %c0_67 = arith.constant 0 : index
    %90 = vector.load %arg3[%c16_66, %c0_67] : memref<72x256xf32, #tpu.memory_space<vmem>>, vector<8x256xf32>
    %91 = arith.mulf %89, %90 : vector<8x256xf32>
    %92 = arith.truncf %91 : vector<8x256xf32> to vector<8x256xbf16>
    %c16_68 = arith.constant 16 : index
    %c0_69 = arith.constant 0 : index
    %93 = vector.load %arg19[%c16_68, %c0_69] : memref<72x256xbf16, #tpu.memory_space<vmem>>, vector<8x256xbf16>
    tpu.vector_store %arg19[%c16_68, %c0_69], %92 {strides = array<i32>} : memref<72x256xbf16, #tpu.memory_space<vmem>>, vector<8x256xbf16>,
    %c1_i32_70 = arith.constant 1 : i32
    %94 = tpu.dynamic_rotate %78 by %c1_i32_70 dim 1 : vector<8x256xf32>, i32 -> vector<8x256xf32>
    %c24_71 = arith.constant 24 : index
    %c0_72 = arith.constant 0 : index
    %95 = vector.load %arg3[%c24_71, %c0_72] : memref<72x256xf32, #tpu.memory_space<vmem>>, vector<8x256xf32>
    %96 = arith.mulf %94, %95 : vector<8x256xf32>
    %97 = arith.truncf %96 : vector<8x256xf32> to vector<8x256xbf16>
    %c24_73 = arith.constant 24 : index
    %c0_74 = arith.constant 0 : index
    %98 = vector.load %arg19[%c24_73, %c0_74] : memref<72x256xbf16, #tpu.memory_space<vmem>>, vector<8x256xbf16>
    tpu.vector_store %arg19[%c24_73, %c0_74], %97 {strides = array<i32>} : memref<72x256xbf16, #tpu.memory_space<vmem>>, vector<8x256xbf16>,
    %99 = arith.truncf %78 : vector<8x256xf32> to vector<8x256xbf16>
    %c32_75 = arith.constant 32 : index
    %c0_76 = arith.constant 0 : index
    %100 = vector.load %arg19[%c32_75, %c0_76] : memref<72x256xbf16, #tpu.memory_space<vmem>>, vector<8x256xbf16>
    tpu.vector_store %arg19[%c32_75, %c0_76], %99 {strides = array<i32>} : memref<72x256xbf16, #tpu.memory_space<vmem>>, vector<8x256xbf16>,
    %c255_i32_77 = arith.constant 255 : i32
    %101 = tpu.dynamic_rotate %78 by %c255_i32_77 dim 1 : vector<8x256xf32>, i32 -> vector<8x256xf32>
    %c40_78 = arith.constant 40 : index
    %c0_79 = arith.constant 0 : index
    %102 = vector.load %arg3[%c40_78, %c0_79] : memref<72x256xf32, #tpu.memory_space<vmem>>, vector<8x256xf32>
    %103 = arith.mulf %101, %102 : vector<8x256xf32>
    %104 = arith.truncf %103 : vector<8x256xf32> to vector<8x256xbf16>
    %c40_80 = arith.constant 40 : index
    %c0_81 = arith.constant 0 : index
    %105 = vector.load %arg19[%c40_80, %c0_81] : memref<72x256xbf16, #tpu.memory_space<vmem>>, vector<8x256xbf16>
    tpu.vector_store %arg19[%c40_80, %c0_81], %104 {strides = array<i32>} : memref<72x256xbf16, #tpu.memory_space<vmem>>, vector<8x256xbf16>,
    %c241_i32_82 = arith.constant 241 : i32
    %106 = tpu.dynamic_rotate %78 by %c241_i32_82 dim 1 : vector<8x256xf32>, i32 -> vector<8x256xf32>
    %c48_83 = arith.constant 48 : index
    %c0_84 = arith.constant 0 : index
    %107 = vector.load %arg3[%c48_83, %c0_84] : memref<72x256xf32, #tpu.memory_space<vmem>>, vector<8x256xf32>
    %108 = arith.mulf %106, %107 : vector<8x256xf32>
    %109 = arith.truncf %108 : vector<8x256xf32> to vector<8x256xbf16>
    %c48_85 = arith.constant 48 : index
    %c0_86 = arith.constant 0 : index
    %110 = vector.load %arg19[%c48_85, %c0_86] : memref<72x256xbf16, #tpu.memory_space<vmem>>, vector<8x256xbf16>
    tpu.vector_store %arg19[%c48_85, %c0_86], %109 {strides = array<i32>} : memref<72x256xbf16, #tpu.memory_space<vmem>>, vector<8x256xbf16>,
    %c240_i32_87 = arith.constant 240 : i32
    %111 = tpu.dynamic_rotate %78 by %c240_i32_87 dim 1 : vector<8x256xf32>, i32 -> vector<8x256xf32>
    %c56_88 = arith.constant 56 : index
    %c0_89 = arith.constant 0 : index
    %112 = vector.load %arg3[%c56_88, %c0_89] : memref<72x256xf32, #tpu.memory_space<vmem>>, vector<8x256xf32>
    %113 = arith.mulf %111, %112 : vector<8x256xf32>
    %114 = arith.truncf %113 : vector<8x256xf32> to vector<8x256xbf16>
    %c56_90 = arith.constant 56 : index
    %c0_91 = arith.constant 0 : index
    %115 = vector.load %arg19[%c56_90, %c0_91] : memref<72x256xbf16, #tpu.memory_space<vmem>>, vector<8x256xbf16>
    tpu.vector_store %arg19[%c56_90, %c0_91], %114 {strides = array<i32>} : memref<72x256xbf16, #tpu.memory_space<vmem>>, vector<8x256xbf16>,
    %c239_i32_92 = arith.constant 239 : i32
    %116 = tpu.dynamic_rotate %78 by %c239_i32_92 dim 1 : vector<8x256xf32>, i32 -> vector<8x256xf32>
    %c64_93 = arith.constant 64 : index
    %c0_94 = arith.constant 0 : index
    %117 = vector.load %arg3[%c64_93, %c0_94] : memref<72x256xf32, #tpu.memory_space<vmem>>, vector<8x256xf32>
    %118 = arith.mulf %116, %117 : vector<8x256xf32>
    %119 = arith.truncf %118 : vector<8x256xf32> to vector<8x256xbf16>
    %c64_95 = arith.constant 64 : index
    %c0_96 = arith.constant 0 : index
    %120 = vector.load %arg19[%c64_95, %c0_96] : memref<72x256xbf16, #tpu.memory_space<vmem>>, vector<8x256xbf16>
    tpu.vector_store %arg19[%c64_95, %c0_96], %119 {strides = array<i32>} : memref<72x256xbf16, #tpu.memory_space<vmem>>, vector<8x256xbf16>,
    %c0_97 = arith.constant 0 : index
    %c0_98 = arith.constant 0 : index
    %121 = vector.load %arg12[%c0_97, %c0_98] : memref<8x72xbf16, #tpu.memory_space<vmem>>, vector<8x72xbf16>
    %c0_99 = arith.constant 0 : index
    %c0_100 = arith.constant 0 : index
    %122 = vector.load %arg19[%c0_99, %c0_100] : memref<72x256xbf16, #tpu.memory_space<vmem>>, vector<72x256xbf16>
    %cst_101 = arith.constant dense<0.000000e+00> : vector<8x256xf32>
    %123 = tpu.matmul %121, %122, %cst_101 {dimension_numbers = #tpu.dot_dimension_numbers<[1], [0], [0], [1], [0, 0, 1, 1], [], []>} : vector<8x72xbf16>, vector<72x256xbf16>, vector<8x256xf32> -> vector<8x256xf32>
    %c0_102 = arith.constant 0 : index
    %c0_103 = arith.constant 0 : index
    %124 = vector.load %arg13[%c0_102, %c0_103] : memref<8x1xf32, #tpu.memory_space<vmem>>, vector<8x1xf32>
    %125 = vector.broadcast %124 : vector<8x1xf32> to vector<8x256xf32>
    %126 = arith.addf %123, %125 : vector<8x256xf32>
    %cst_104 = arith.constant 0.000000e+00 : f32
    %127 = vector.broadcast %cst_104 : f32 to vector<8x256xf32>
    %128 = arith.maximumf %126, %127 : vector<8x256xf32>
    %c0_105 = arith.constant 0 : index
    %c0_106 = arith.constant 0 : index
    %129 = vector.load %arg14[%c0_105, %c0_106] : memref<32x8xbf16, #tpu.memory_space<vmem>>, vector<32x8xbf16>
    %130 = arith.truncf %128 : vector<8x256xf32> to vector<8x256xbf16>
    %cst_107 = arith.constant dense<0.000000e+00> : vector<32x256xf32>
    %131 = tpu.matmul %129, %130, %cst_107 {dimension_numbers = #tpu.dot_dimension_numbers<[1], [0], [0], [1], [0, 0, 1, 1], [], []>} : vector<32x8xbf16>, vector<8x256xbf16>, vector<32x256xf32> -> vector<32x256xf32>
    %c0_108 = arith.constant 0 : index
    %c0_109 = arith.constant 0 : index
    %132 = vector.load %arg15[%c0_108, %c0_109] : memref<32x1xf32, #tpu.memory_space<vmem>>, vector<32x1xf32>
    %133 = vector.broadcast %132 : vector<32x1xf32> to vector<32x256xf32>
    %134 = arith.addf %131, %133 : vector<32x256xf32>
    %135 = arith.addf %134, %70 : vector<32x256xf32>
    %c0_110 = arith.constant 0 : index
    %c0_111 = arith.constant 0 : index
    %136 = vector.load %arg16[%c0_110, %c0_111] : memref<32x32xbf16, #tpu.memory_space<vmem>>, vector<32x32xbf16>
    %137 = arith.truncf %135 : vector<32x256xf32> to vector<32x256xbf16>
    %cst_112 = arith.constant dense<0.000000e+00> : vector<32x256xf32>
    %138 = tpu.matmul %136, %137, %cst_112 {dimension_numbers = #tpu.dot_dimension_numbers<[1], [0], [0], [1], [0, 0, 1, 1], [], []>} : vector<32x32xbf16>, vector<32x256xbf16>, vector<32x256xf32> -> vector<32x256xf32>
    %c0_113 = arith.constant 0 : index
    %c0_114 = arith.constant 0 : index
    %139 = vector.load %arg17[%c0_113, %c0_114] : memref<32x1xf32, #tpu.memory_space<vmem>>, vector<32x1xf32>
    %140 = vector.broadcast %139 : vector<32x1xf32> to vector<32x256xf32>
    %141 = arith.addf %138, %140 : vector<32x256xf32>
    %c0_115 = arith.constant 0 : index
    %c0_116 = arith.constant 0 : index
    %c0_117 = arith.constant 0 : index
    %142 = vector.load %arg18[%c0_115, %c0_116, %c0_117] : memref<1x32x256xf32, #tpu.memory_space<vmem>>, vector<1x32x256xf32>
    %143 = vector.shape_cast %142 : vector<1x32x256xf32> to vector<32x256xf32>
    %144 = vector.shape_cast %141 : vector<32x256xf32> to vector<1x32x256xf32>
    tpu.vector_store %arg18[%c0_115, %c0_116, %c0_117], %144 {strides = array<i32>} : memref<1x32x256xf32, #tpu.memory_space<vmem>>, vector<1x32x256xf32>,
    return
  }
  func.func @transform_0(%arg0: i32) -> (i32, i32, i32) {
    %c0_i32 = arith.constant 0 : i32
    %c0_i32_0 = arith.constant 0 : i32
    %c0_i32_1 = arith.constant 0 : i32
    return %arg0, %c0_i32, %c0_i32_0 : i32, i32, i32
  }
  func.func @transform_1(%arg0: i32) -> (i32, i32, i32) {
    %c0_i32 = arith.constant 0 : i32
    %c0_i32_0 = arith.constant 0 : i32
    %c0_i32_1 = arith.constant 0 : i32
    return %arg0, %c0_i32, %c0_i32_0 : i32, i32, i32
  }
  func.func @transform_2(%arg0: i32) -> (i32, i32) {
    %c0_i32 = arith.constant 0 : i32
    %c0_i32_0 = arith.constant 0 : i32
    %c0_i32_1 = arith.constant 0 : i32
    return %c0_i32, %c0_i32_0 : i32, i32
  }
  func.func @transform_3(%arg0: i32) -> (i32, i32) {
    %c0_i32 = arith.constant 0 : i32
    %c0_i32_0 = arith.constant 0 : i32
    %c0_i32_1 = arith.constant 0 : i32
    return %c0_i32, %c0_i32_0 : i32, i32
  }
  func.func @transform_4(%arg0: i32) -> (i32, i32) {
    %c0_i32 = arith.constant 0 : i32
    %c0_i32_0 = arith.constant 0 : i32
    %c0_i32_1 = arith.constant 0 : i32
    return %c0_i32, %c0_i32_0 : i32, i32
  }
  func.func @transform_5(%arg0: i32) -> (i32, i32) {
    %c0_i32 = arith.constant 0 : i32
    %c0_i32_0 = arith.constant 0 : i32
    %c0_i32_1 = arith.constant 0 : i32
    return %c0_i32, %c0_i32_0 : i32, i32
  }
  func.func @transform_6(%arg0: i32) -> (i32, i32) {
    %c0_i32 = arith.constant 0 : i32
    %c0_i32_0 = arith.constant 0 : i32
    %c0_i32_1 = arith.constant 0 : i32
    return %c0_i32, %c0_i32_0 : i32, i32
  }
  func.func @transform_7(%arg0: i32) -> (i32, i32) {
    %c0_i32 = arith.constant 0 : i32
    %c0_i32_0 = arith.constant 0 : i32
    %c0_i32_1 = arith.constant 0 : i32
    return %c0_i32, %c0_i32_0 : i32, i32
  }
  func.func @transform_8(%arg0: i32) -> (i32, i32) {
    %c0_i32 = arith.constant 0 : i32
    %c0_i32_0 = arith.constant 0 : i32
    %c0_i32_1 = arith.constant 0 : i32
    return %c0_i32, %c0_i32_0 : i32, i32
  }
  func.func @transform_9(%arg0: i32) -> (i32, i32) {
    %c0_i32 = arith.constant 0 : i32
    %c0_i32_0 = arith.constant 0 : i32
    %c0_i32_1 = arith.constant 0 : i32
    return %c0_i32, %c0_i32_0 : i32, i32
  }
  func.func @transform_10(%arg0: i32) -> (i32, i32) {
    %c0_i32 = arith.constant 0 : i32
    %c0_i32_0 = arith.constant 0 : i32
    %c0_i32_1 = arith.constant 0 : i32
    return %c0_i32, %c0_i32_0 : i32, i32
  }
  func.func @transform_11(%arg0: i32) -> (i32, i32) {
    %c0_i32 = arith.constant 0 : i32
    %c0_i32_0 = arith.constant 0 : i32
    %c0_i32_1 = arith.constant 0 : i32
    return %c0_i32, %c0_i32_0 : i32, i32
  }
  func.func @transform_12(%arg0: i32) -> (i32, i32) {
    %c0_i32 = arith.constant 0 : i32
    %c0_i32_0 = arith.constant 0 : i32
    %c0_i32_1 = arith.constant 0 : i32
    return %c0_i32, %c0_i32_0 : i32, i32
  }
  func.func @transform_13(%arg0: i32) -> (i32, i32) {
    %c0_i32 = arith.constant 0 : i32
    %c0_i32_0 = arith.constant 0 : i32
    %c0_i32_1 = arith.constant 0 : i32
    return %c0_i32, %c0_i32_0 : i32, i32
  }
  func.func @transform_14(%arg0: i32) -> (i32, i32) {
    %c0_i32 = arith.constant 0 : i32
    %c0_i32_0 = arith.constant 0 : i32
    %c0_i32_1 = arith.constant 0 : i32
    return %c0_i32, %c0_i32_0 : i32, i32
  }
  func.func @transform_15(%arg0: i32) -> (i32, i32) {
    %c0_i32 = arith.constant 0 : i32
    %c0_i32_0 = arith.constant 0 : i32
    %c0_i32_1 = arith.constant 0 : i32
    return %c0_i32, %c0_i32_0 : i32, i32
  }
  func.func @transform_16(%arg0: i32) -> (i32, i32) {
    %c0_i32 = arith.constant 0 : i32
    %c0_i32_0 = arith.constant 0 : i32
    %c0_i32_1 = arith.constant 0 : i32
    return %c0_i32, %c0_i32_0 : i32, i32
  }
  func.func @transform_17(%arg0: i32) -> (i32, i32, i32) {
    %c0_i32 = arith.constant 0 : i32
    %c0_i32_0 = arith.constant 0 : i32
    %c0_i32_1 = arith.constant 0 : i32
    return %arg0, %c0_i32, %c0_i32_0 : i32, i32, i32
  }
}

</mosaic_0001>

<bundles_post_ra>
// kernel: tpu_custom_call.1
= control target key start
LH: loop header
LB: loop body
LE: loop exit
PB: predicated region body
PF: predicated region fallthrough
CT: control target
= control target key end

     0   :  { %s2737_s0 = inlined_call_operand.vmem [shape: f32[2,32,1], index: 0, kind: input, shape index: {}]   ;;  %s2738_s1 = inlined_call_operand.hbm [shape: f32[2,32,256], index: 1, kind: input, shape index: {}]   ;;  %s2739_s2 = inlined_call_operand.vmem [shape: f32[72,256], index: 2, kind: input, shape index: {}]   ;;  %s2740_s3 = inlined_call_operand.vmem [shape: bf16[8,32], index: 3, kind: input, shape index: {}]   ;;  %s2741_s4 = inlined_call_operand.vmem [shape: f32[8,1], index: 4, kind: input, shape index: {}]   ;;  %s2742_s5 = inlined_call_operand.vmem [shape: bf16[8,72], index: 5, kind: input, shape index: {}]   ;;  %s2743_s6 = inlined_call_operand.vmem [shape: f32[8,1], index: 6, kind: input, shape index: {}]   ;;  %s2744_s7 = inlined_call_operand.vmem [shape: bf16[32,8], index: 7, kind: input, shape index: {}]   ;;  %s2745_s8 = inlined_call_operand.vmem [shape: f32[32,1], index: 8, kind: input, shape index: {}]   ;;  %s2746_s9 = inlined_call_operand.vmem [shape: bf16[8,32], index: 9, kind: input, shape index: {}]   ;;  %s2747_s10 = inlined_call_operand.vmem [shape: f32[8,1], index: 10, kind: input, shape index: {}]   ;;  %s2748_s11 = inlined_call_operand.vmem [shape: bf16[8,72], index: 11, kind: input, shape index: {}]   ;;  %s2749_s12 = inlined_call_operand.vmem [shape: f32[8,1], index: 12, kind: input, shape index: {}]   ;;  %s2750_s13 = inlined_call_operand.vmem [shape: bf16[32,8], index: 13, kind: input, shape index: {}]   ;;  %s2751_s14 = inlined_call_operand.vmem [shape: f32[32,1], index: 14, kind: input, shape index: {}]   ;;  %s2752_s15 = inlined_call_operand.vmem [shape: bf16[32,32], index: 15, kind: input, shape index: {}]   ;;  %s2753_s16 = inlined_call_operand.vmem [shape: f32[32,1], index: 16, kind: input, shape index: {}]   ;;  %s2754_s17 = inlined_call_operand.hbm [shape: f32[2,32,256], index: 17, kind: output, shape index: {}]  }
   0x1   :  { %2780 = sst [smem:[#allocation14_spill]] %s2737_s0 }
   0x2   :  { %2781 = sst [smem:[#allocation15_spill]] %s2738_s1 }
   0x3   :  { %2782 = sst [smem:[#allocation16_spill]] %s2739_s2 }
   0x4   :  { %2783 = sst [smem:[#allocation17_spill]] %s2740_s3 }
   0x5   :  { %2784 = sst [smem:[#allocation18_spill]] %s2750_s13 }
   0x6   :  { %2785 = sst [smem:[#allocation19_spill]] %s2752_s15 }
   0x7   :  { %2786 = sst [smem:[#allocation20_spill]] %s2754_s17 }
   0x8   :  { %22 = vsyncpa [#allocation4], 0 }
   0x9   :  { %24 = vsyncpa [#allocation4 + $0x1], 0 }
   0xa   :  { %25 = vsyncpa [#allocation5], 0 }
   0xb   :  { %27 = vsyncpa [#allocation5 + $0x1], 0  ;;  %s2121_s24 = smov 0   ;;  %s2123_s25 = smov 0  }
   0xc   :  { %s2125_s26 = smov 0   ;;  %s2127_s27 = smov 0  }
   0xd LB: > { %2787 = sst [smem:[#allocation9_spill]] %s2003_s24  ;;  %s2142_s28 = sadd.s32 4294967295, %s2015_s27   ;;  %s2015_s27 = sphi %s2127_s27, %s2820_s27   ;;  %s2011_s26 = sphi %s2125_s26, %s2822_s26   ;;  %s2007_s25 = sphi %s2123_s25, %s2824_s25   ;;  %s2003_s24 = sphi %s2121_s24, %s2823_s24  }
   0xe   : > { %2788 = sst [smem:[#allocation10_spill]] %s2011_s26  ;;  %s1738_s29 = sadd.s32 4294967294, %s2015_s27  }
   0xf   : > { %s2146_s0 = sadd.s32 1, %s2015_s27   ;;  %s66_s30 = sadd.s32 1, %s2011_s26 }
  0x10   : > { %2789 = sst [smem:[#allocation11_spill]] %s2146_s0  ;;  %s63_s18 = ssub.s32 %s2015_s27, %s2146_s0 }
  0x11   : > { %p73_p0 = scmp.ne.s32.totalorder %s2011_s26, %s2007_s25  ;;  %p64_p1 = scmp.eq.s32.totalorder %s63_s18, 0 }
  0x12   : > { %p74_p2 = scmp.eq.s32.totalorder %s2015_s27, 0  ;;  %p79_p3 = scmp.ne.s32.totalorder %s2007_s25, %s2003_s24 }
  0x13   : > { %p80_p4 = scmp.eq.s32.totalorder %s2142_s28, 0  ;;  %p418_p7 = scmp.eq.s32.totalorder %s2142_s28, 1 }
  0x14   : > { %s2158_s19 = scalar_select %p64_p1, %s2011_s26, %s66_s30  }
  0x15   : > { %p2160_p5 = por %p74_p2, %p73_p0  ;;  %p2164_p6 = por %p80_p4, %p79_p3 }
  0x16   : > { %2790 = sst [smem:[#allocation12_spill]] %s2158_s19  ;;  %p424_p8 = scmp.eq.s32.totalorder %s1738_s29, 1 }
  0x17   : > { %p1865_p10 = scmp.lt.s32.totalorder %s2015_s27, 2  ;;  %p2171_p11 = por %p418_p7, %p73_p0 }
  0x18   : > { %p2175_p12 = por %p424_p8, %p79_p3  ;;  %s497_s23 = sand.u32 1, %s2011_s26  }
  0x19   : > { %s2793_s21 = scalar_select %p2171_p11, 1, 0 }
  0x1a   : > { %s2795_s22 = scalar_select %p2175_p12, 1, 0 }
  0x1b   : > { %2794 = sst [smem:[#allocation13_spill]] %s2793_s21  ;;  %s1812_s30 = sshll.u32 %s2015_s27, 10 }
  0x1c   : > { %s1741_s18 = sshll.u32 %s497_s23, 6  ;;  %s2796_s24 = sld [smem:[#allocation15_spill]] }
  0x1d   : > { %s501_s29 = scalar_lea.vmem [#allocation3], %s1741_s18  ;;  %p2188_p13 = pnand %p1865_p10, %p2160_p5 }
  0x1e   : > { %s508_s13 = sshll.u32 %s501_s29, 4  ;;  %s2194_s26 = scalar_lea.sflag [#allocation4], %s497_s23  ;;  %s2192_s13 = int_to_ptr.vmem [resolvable:$true] %s508_s13 }
  0x1f   : > { %p1921_p1 = pneg %p2188_p13 }
  0x22   : > { %s2797_s17 = smov %s2796_s24  ;;  %s2184_s15 = scalar_lea.hbm %s2796_s24, %s1812_s30 }
  0x23   : > { %s1919_s0 = scalar_lea.hbm %s2184_s15, 1024  ;;  %s1924_s1 = scalar_lea.hbm %s2797_s17, 2048 }
  0x24   : > { %p1920_p0 = scmp.ne.s32.totalorder %s2184_s15, %s1919_s0  ;;  %p1925_p4 = scmp.lt.u32.totalorder %s2184_s15, %s2797_s17 }
  0x25   : > { %p1926_p5 = scmp.lt.u32.totalorder %s1924_s1, %s1919_s0  ;;  %p1928_p8 = scmp.lt.u32.totalorder %s1919_s0, %s2184_s15 }
  0x26   : > { %p1922_p2 = pnand %p1921_p1, %p1920_p0 }
  0x27   : > { %p1927_p7 = por %p1926_p5, %p1925_p4 }
  0x28   : > { %p1923_p3 = pneg %p1922_p2 }
  0x29   : > { %p1929_p10 = por %p1928_p8, %p1927_p7 }
  0x2b   : > { %p1930_p9 = pnand %p1929_p10, %p1923_p3 }
  0x2d   : > { %1933 = shalt.err (!%p1930_p9)
}
  0x2e   : > { %s1934_s23 = scalar_lea.vmem %s2192_s13, 1024  ;;  %s2017_s29 = smov [#allocation3]  }
  0x2f   : > { %p1935_p0 = scmp.ne.s32.totalorder %s2192_s13, %s1934_s23  ;;  %s1939_s24 = sshll.u32 %s2017_s29, 4  ;;  %s1940_s24 = int_to_ptr.vmem [resolvable:$false] %s1939_s24 }
  0x30   : > { %s1941_s19 = scalar_lea.vmem %s1940_s24, 2048  ;;  %p1942_p11 = scmp.lt.s32.totalorder %s2192_s13, %s1940_s24 }
  0x31   : > { %p1937_p2 = pnand %p1935_p0, %p1921_p1  ;;  %p1943_p4 = scmp.lt.s32.totalorder %s1941_s19, %s1934_s23 }
  0x33   : > { %p1938_p12 = pneg %p1937_p2  ;;  %p1944_p5 = por %p1943_p4, %p1942_p11 }
  0x35   : > { %p1945_p7 = pnand %p1944_p5, %p1938_p12 }
  0x37   : > { %1948 = shalt.err (!%p1945_p7)
}
  0x38   : > { %s2018_s0 = smov 256   ;;  %s2019_s1 = smov 16  }
  0x39   : > { %1860 = dma.hbm_to_vmem [thread:$0]  (!%p2188_p13), %s2184_s15, 1024, %s2192_s13, %s2194_s26, %s2018_s0, %s2018_s0, %s2019_s1  }
  0x3a   : > { %p1744_p9 = scmp.ge.s32.totalorder %s2015_s27, 1  ;;  %p516_p1 = scmp.lt.s32.totalorder %s2015_s27, 3 }
  0x3c   : > { %p517_p3 = pnand %p1744_p9, %p516_p1 }
  0x3d   : > { %s2225_s30 = sand.u32 (!%p517_p3), 1, %s2007_s25  }
  0x3e   : > { %520 = sbr.rel (%p517_p3) target bundleno = 2112 (0x840), region = 88  ;;  %s2766_s18 = sshll.u32 (!%p517_p3), %s2225_s30, 6 }
  0x3f   : > { %s523_s23 = scalar_lea.sflag (!%p517_p3), [#allocation4], %s2225_s30  ;;  %s2231_s29 = scalar_lea.vmem (!%p517_p3), [#allocation3], %s2766_s18 }
  0x45   : > { %1994 = dma.done.wait (%p2164_p6), %s523_s23, 1024  }
  0x46   : > { %1996 = vsyncadd (%p2164_p6), %s523_s23, 4294966272  ;;  %p582_p11 = scmp.lt.s32.totalorder %s2142_s28, 1  ;;  %v2020_v0 = vmov 0   ;;  %s2799_s20 = sld [smem:[#allocation14_spill]]  ;;  %v633_v5 = vld [vmem:[%s2741_s4] sm:$0xff]  ;;  %v593_v8 = vld [vmem:[%s2231_s29 + $0x28] sm:$0xff]  ;;  %v690_v46 = vlaneseq }
  0x47   : > { %1912 = vset.pattern.permute.xlu1 %v2020_v0  ;;  %1911 = vset.pattern.permute.xlu0 %v2020_v0  ;;  %v588_v9 = vld [vmem:[%s2231_s29] sm:$0xff]  ;;  %v589_v10 = vld [vmem:[%s2231_s29 + $0x8] sm:$0xff]  ;;  %v595_v11 = vld [vmem:[%s2231_s29 + $0x38] sm:$0xff]  ;;  %s2800_s3 = sld [smem:[#allocation17_spill]]  ;;  %vm639_vm0 = vcmask 261120   ;;  %s2773_s26 = smov 1  }
  0x48   : > { %s583_s13 = scalar_select %p582_p11, %s2142_s28, 1  ;;  %675 = vmatprep.mubr.bf16.mxu0 %v2020_v0  ;;  %961 = vmatprep.mubr.bf16.mxu1 %v2020_v0  ;;  %v590_v12 = vld [vmem:[%s2231_s29 + $0x10] sm:$0xff]  ;;  %v591_v13 = vld [vmem:[%s2231_s29 + $0x18] sm:$0xff]  ;;  %v592_v18 = vld [vmem:[%s2231_s29 + $0x20] sm:$0xff]  ;;  %v2340_v47 = vand.u32 127, %v690_v46  ;;  %vm922_vm9 = vcmask 1043456  }
  0x49   : > { %v594_v20 = vld [vmem:[%s2231_s29 + $0x30] sm:$0xff]  ;;  %s2021_s29 = smov 17   ;;  %s2769_s21 = smov 127   ;;  %v867_v40 = vld [vmem:[%s2743_s6] sm:$0xff]  ;;  %v979_v42 = vld [vmem:[%s2745_s8 + $0x8] sm:$0xff]  ;;  %vm918_vm10 = vcmask 588800  }
  0x4a   : > { %s1813_s15 = sshll.u32 %s583_s13, 5  ;;  %s2779_s13 = smov 16   ;;  %v978_v41 = vld [vmem:[%s2745_s8] sm:$0xff]  ;;  %v980_v43 = vld [vmem:[%s2745_s8 + $0x10] sm:$0xff]  ;;  %v981_v44 = vld [vmem:[%s2745_s8 + $0x18] sm:$0xff]  ;;  %vm692_vm1 = vcmp.lt.s32.totalorder %v2340_v47, 17 }
  0x4b   : > { %s2775_s19 = smov 111   ;;  %v1091_v45 = vld [vmem:[%s2747_s10] sm:$0xff]  ;;  %s2801_s2 = sld [smem:[#allocation16_spill]]  ;;  %vm712_vm2 = vcmp.lt.s32.totalorder %v2340_v47, 16  ;;  %vm732_vm3 = vcmp.lt.s32.totalorder %v2340_v47, 15  ;;  %vm752_vm4 = vcmp.lt.s32.totalorder %v2340_v47, 1 }
  0x4c   : > { %s586_s24 = scalar_lea.vmem %s2799_s20, %s1813_s15  ;;  %s2777_s15 = smov 15   ;;  %vm781_vm5 = vcmp.lt.s32.totalorder %v2340_v47, 127  ;;  %vm801_vm6 = vcmp.lt.s32.totalorder %v2340_v47, 113  ;;  %vm821_vm7 = vcmp.lt.s32.totalorder %v2340_v47, 112  ;;  %vm841_vm8 = vcmp.lt.s32.totalorder %v2340_v47, 111 }
  0x4d   : > { %v598_v1 = vld [vmem:[%s586_s24 + $0x10] sm:$0xff]  ;;  %v596_v2 = vld [vmem:[%s586_s24] sm:$0xff]  ;;  %v599_v3 = vld [vmem:[%s586_s24 + $0x18] sm:$0xff]  ;;  %s2767_s20 = smov 113   ;;  %vm1012_vm11 = vcmask 64512   ;;  %s2802_s18 = smov 15  }
  0x4e   : > { %612 = vperm.xlu1 %1912, %v598_v1   ;;  %602 = vperm.xlu0 %1911, %v596_v2   ;;  %v597_v4 = vld [vmem:[%s586_s24 + $0x8] sm:$0xff]  ;;  %v628_v30 = vld [vmem:[%s2800_s3] sm:$0xf]  ;;  %s2771_s24 = smov 112   ;;  %s1832_s0 = sshll.u32 %s2142_s28, 10 }
  0x4f   : > { %s2813_s1 = sld [smem:[#allocation13_spill]]  ;;  %s1640_s28 = scalar_lea.sflag [#allocation5], %s2225_s30 }
  0x51   : > { %v2346_v50 = vld [vmem:[%s2801_s2] sm:$0xff]  ;;  %v2356_v54 = vld [vmem:[%s2801_s2 + $0x10] sm:$0xff]  ;;  %v2361_v55 = vld [vmem:[%s2801_s2 + $0x8] sm:$0xff] }
  0x52   : > { %617 = vperm.xlu1 %1912, %v599_v3   ;;  %607 = vperm.xlu0 %1911, %v597_v4   ;;  %v2366_v56 = vld [vmem:[%s2801_s2 + $0x18] sm:$0xff]  ;;  %v2448_v46 = vld [vmem:[%s2801_s2 + $0x70] sm:$0xff] }
  0x55   : > { %p2815_p12 = scmp.ne.s32.totalorder %s2813_s1, 0 }
  0x56   : > { %636 = vperm.xlu0 %1911, %v633_v5   ;;  %v2380_v5 = vld [vmem:[%s2801_s2 + $0x20] sm:$0xff] }
  0xcd   : > { %v613_v6 = vpop.permute.xlu1 %612  ;;  %v603_v7 = vpop.permute.xlu0 %602 }
  0xce   : > { %v2255_v14 = vadd.f32 %v613_v6, %v593_v8  ;;  %v2257_v15 = vadd.f32 %v603_v7, %v588_v9  ;;  %v2260_v19 = vadd.f32 %v603_v7, %v589_v10  ;;  %v2273_v26 = vadd.f32 %v613_v6, %v592_v18  ;;  %v2386_v6 = vld [vmem:[%s2801_s2 + $0x28] sm:$0xff]  ;;  %v2395_v10 = vld [vmem:[%s2801_s2 + $0x30] sm:$0xff] }
  0xd1   : > { %v618_v16 = vpop.permute.xlu1 %617  ;;  %v608_v17 = vpop.permute.xlu0 %607 }
  0xd2   : > { %v2263_v21 = vadd.f32 %v618_v16, %v595_v11  ;;  %v2265_v22 = vadd.f32 %v608_v17, %v590_v12  ;;  %v2267_v23 = vadd.f32 %v608_v17, %v591_v13  ;;  %v2275_v27 = vadd.f32 %v618_v16, %v594_v20  ;;  %v2400_v11 = vld [vmem:[%s2801_s2 + $0x38] sm:$0xff] }
  0xd4   : > { %v630_v24 = vpack.c.bf16 %v2267_v23, %v2260_v19  ;;  %v629_v25 = vpack.c.bf16 %v2265_v22, %v2257_v15  ;;  %v632_v28 = vpack.c.bf16 %v2263_v21, %v2255_v14  ;;  %v631_v29 = vpack.c.bf16 %v2275_v27, %v2273_v26 }
  0xd5   : > { %v637_v31 = vpop.permute.xlu0 %636 }
  0xd6   : > { %643 = vmatprep.subr.bf16.mxu0 %v630_v24 }
  0xd7   : > { %644 = vmatpush1.bf16.msra.mxu0 %v629_v25 }
  0xd8   : > { %645 = vmatprep.subr.bf16.mxu0 %v632_v28  ;;  %v2414_v28 = vld [vmem:[%s2801_s2 + $0x50] sm:$0xff] }
  0xdb   : > { %646 = vmatpush1.bf16.msra.mxu0 %v631_v29  ;;  %v2419_v29 = vld [vmem:[%s2801_s2 + $0x58] sm:$0xff] }
  0xde   : > { %1749 = vmatmul.mubr.msk.bf16.vlgmr.msra.gmra.mrb[0].mxu0 %vm639_vm0, %v628_v30 }
  0xdf   : > { %1057 = vmatprep.mubr.bf16.mxu0 %v2020_v0 }
 0x1b1   : > { %v677_v32 = vpop.f32.mrb[0].mxu0 }
 0x1b2   : > { %v678_v33 = vadd.f32 %v677_v32, %v637_v31  ;;  %v679_v34 = vpop.f32.mrb[1].mxu0 }
 0x1b3   : > { %v680_v35 = vadd.f32 %v679_v34, %v637_v31  ;;  %v681_v36 = vpop.f32.mrb[2].mxu0 }
 0x1b4   : > { %v2286_v37 = vmax.f32 %v678_v33, 0.0  ;;  %v682_v38 = vpop.f32.mrb[3].mxu0 }
 0x1b5   : > { %v2288_v39 = vmax.f32 %v680_v35, 0.0 }
 0x1b6   : > { %686 = vrot.lane.b32.xlu1 %v2286_v37, %s2021_s29 }
 0x1b7   : > { %688 = vrot.lane.b32.xlu0 %v2288_v39, %s2021_s29 }
 0x1ba   : > { %708 = vrot.lane.b32.xlu1 %v2286_v37, %s2779_s13 }
 0x1bb   : > { %710 = vrot.lane.b32.xlu0 %v2288_v39, %s2779_s13 }
 0x1be   : > { %728 = vrot.lane.b32.xlu1 %v2286_v37, %s2777_s15 }
 0x1bf   : > { %730 = vrot.lane.b32.xlu0 %v2288_v39, %s2777_s15  ;;  %s2804_s15 = smov 127  }
 0x1c2   : > { %748 = vrot.lane.b32.xlu1 %v2286_v37, %s2773_s26 }
 0x1c3   : > { %750 = vrot.lane.b32.xlu0 %v2288_v39, %s2773_s26  ;;  %s2803_s26 = smov 1  }
 0x1c6   : > { %777 = vrot.lane.b32.xlu1 %v2286_v37, %s2769_s21 }
 0x1c7   : > { %779 = vrot.lane.b32.xlu0 %v2288_v39, %s2769_s21  ;;  %s2806_s21 = smov 112  }
 0x1ca   : > { %797 = vrot.lane.b32.xlu1 %v2286_v37, %s2767_s20 }
 0x1cb   : > { %799 = vrot.lane.b32.xlu0 %v2288_v39, %s2767_s20  ;;  %s2807_s20 = smov 111  }
 0x1ce   : > { %817 = vrot.lane.b32.xlu1 %v2286_v37, %s2771_s24 }
 0x1cf   : > { %819 = vrot.lane.b32.xlu0 %v2288_v39, %s2771_s24  ;;  %s2808_s24 = sld [smem:[#allocation18_spill]] }
 0x1d2   : > { %837 = vrot.lane.b32.xlu1 %v2286_v37, %s2775_s19 }
 0x1d3   : > { %839 = vrot.lane.b32.xlu0 %v2288_v39, %s2775_s19 }
 0x1d5   : > { %s2809_s19 = smov %s2808_s24 }
 0x1d6   : > { %870 = vperm.xlu1 %1912, %v867_v40  }
 0x1d7   : > { %984 = vperm.xlu0 %1911, %v978_v41  }
 0x1da   : > { %989 = vperm.xlu1 %1912, %v979_v42  }
 0x1db   : > { %994 = vperm.xlu0 %1911, %v980_v43   ;;  %v2433_v43 = vld [vmem:[%s2801_s2 + $0x60] sm:$0xff] }
 0x1de   : > { %999 = vperm.xlu1 %1912, %v981_v44   ;;  %v2439_v44 = vld [vmem:[%s2801_s2 + $0x68] sm:$0xff] }
 0x1df   : > { %1094 = vperm.xlu0 %1911, %v1091_v45  }
 0x228   : > { %v687_v48 = vpop.permute.xlu1 %686 }
 0x229   : > { %v689_v49 = vpop.permute.xlu0 %688 }
 0x22a   : > { %v693_v51 = vsel %vm692_vm1, %v687_v48, %v689_v49  ;;  %v694_v52 = vsel %vm692_vm1, %v689_v49, %v687_v48  ;;  %v2453_v48 = vld [vmem:[%s2801_s2 + $0x78] sm:$0xff] }
 0x22b   : > { %v697_v60 = vmul.f32 %v2346_v50, %v694_v52  ;;  %v698_v62 = vmul.f32 %v2361_v55, %v693_v51 }
 0x22c   : > { %v709_v53 = vpop.permute.xlu1 %708 }
 0x22d   : > { %v711_v57 = vpop.permute.xlu0 %710 }
 0x22e   : > { %v713_v58 = vsel %vm712_vm2, %v709_v53, %v711_v57  ;;  %v714_v59 = vsel %vm712_vm2, %v711_v57, %v709_v53 }
 0x22f   : > { %v717_v61 = vmul.f32 %v2356_v54, %v714_v59  ;;  %v718_v63 = vmul.f32 %v2366_v56, %v713_v58 }
 0x230   : > { %v729_v1 = vpop.permute.xlu1 %728 }
 0x231   : > { %v731_v2 = vpop.permute.xlu0 %730  ;;  %v1834_v3 = vpack.c.bf16 %v718_v63, %v698_v62  ;;  %v1833_v4 = vpack.c.bf16 %v717_v61, %v697_v60  ;;  %v2467_v61 = vld [vmem:[%s2801_s2 + $0x80] sm:$0xff]  ;;  %v2472_v62 = vld [vmem:[%s2801_s2 + $0x88] sm:$0xff] }
 0x232   : > { %v733_v7 = vsel %vm732_vm3, %v729_v1, %v731_v2  ;;  %v734_v8 = vsel %vm732_vm3, %v731_v2, %v729_v1 }
 0x233   : > { %929 = vmatprep.subr.bf16.mxu1 %v1834_v3  ;;  %v737_v17 = vmul.f32 %v2380_v5, %v734_v8  ;;  %v738_v18 = vmul.f32 %v2386_v6, %v733_v7 }
 0x234   : > { %930 = vmatpush1.bf16.msra.mxu1 %v1833_v4  ;;  %v749_v9 = vpop.permute.xlu1 %748 }
 0x235   : > { %v751_v12 = vpop.permute.xlu0 %750 }
 0x236   : > { %v753_v13 = vsel %vm752_vm4, %v749_v9, %v751_v12  ;;  %v754_v16 = vsel %vm752_vm4, %v751_v12, %v749_v9 }
 0x237   : > { %v757_v20 = vmul.f32 %v2395_v10, %v754_v16  ;;  %v758_v24 = vmul.f32 %v2400_v11, %v753_v13  ;;  %v857_v16 = vld [vmem:[%s2742_s5] sm:$0xf] }
 0x238   : > { %v778_v25 = vpop.permute.xlu1 %777 }
 0x239   : > { %v780_v30 = vpop.permute.xlu0 %779  ;;  %v1836_v31 = vpack.c.bf16 %v758_v24, %v738_v18  ;;  %v1835_v32 = vpack.c.bf16 %v757_v20, %v737_v17 }
 0x23a   : > { %v782_v33 = vsel %vm781_vm5, %v778_v25, %v780_v30  ;;  %v783_v34 = vsel %vm781_vm5, %v780_v30, %v778_v25 }
 0x23b   : > { %v786_v35 = vmul.f32 %v2414_v28, %v782_v33  ;;  %v787_v36 = vmul.f32 %v2419_v29, %v783_v34  ;;  %931 = vmatprep.subr.bf16.mxu1 %v1836_v31 }
 0x23c   : > { %932 = vmatpush1.bf16.msra.mxu1 %v1835_v32  ;;  %v798_v38 = vpop.permute.xlu1 %797 }
 0x23d   : > { %v800_v40 = vpop.permute.xlu0 %799  ;;  %v1838_v41 = vpack.c.bf16 %v787_v36, %v2288_v39  ;;  %v1837_v42 = vpack.c.bf16 %v786_v35, %v2286_v37 }
 0x23e   : > { %v802_v45 = vsel %vm801_vm6, %v798_v38, %v800_v40  ;;  %v803_v39 = vsel %vm801_vm6, %v800_v40, %v798_v38  ;;  %v1913_v38 = vld [vmem:[%s2744_s7] sm:$0xff]   ;;  %v1914_v40 = vld [vmem:[%s2744_s7 + $0x8] sm:$0xff]  }
 0x23f   : > { %933 = vmatprep.subr.bf16.mxu1 %v1838_v41  ;;  %v806_v53 = vmul.f32 %v2433_v43, %v802_v45  ;;  %v807_v57 = vmul.f32 %v2439_v44, %v803_v39 }
 0x240   : > { %934 = vmatpush1.bf16.msra.mxu1 %v1837_v42  ;;  %v818_v37 = vpop.permute.xlu1 %817 }
 0x241   : > { %v820_v49 = vpop.permute.xlu0 %819 }
 0x242   : > { %v822_v51 = vsel %vm821_vm7, %v818_v37, %v820_v49  ;;  %v823_v52 = vsel %vm821_vm7, %v820_v49, %v818_v37 }
 0x243   : > { %v826_v58 = vmul.f32 %v2448_v46, %v822_v51  ;;  %v827_v59 = vmul.f32 %v2453_v48, %v823_v52 }
 0x244   : > { %v838_v60 = vpop.permute.xlu1 %837 }
 0x245   : > { %v840_v63 = vpop.permute.xlu0 %839  ;;  %v1840_v1 = vpack.c.bf16 %v827_v59, %v807_v57  ;;  %v1839_v2 = vpack.c.bf16 %v826_v58, %v806_v53 }
 0x246   : > { %v842_v3 = vsel %vm841_vm8, %v838_v60, %v840_v63  ;;  %v843_v4 = vsel %vm841_vm8, %v840_v63, %v838_v60 }
 0x247   : > { %v846_v7 = vmul.f32 %v2467_v61, %v842_v3  ;;  %v847_v8 = vmul.f32 %v2472_v62, %v843_v4  ;;  %935 = vmatprep.subr.bf16.mxu1 %v1840_v1 }
 0x248   : > { %936 = vmatpush1.bf16.msra.mxu1 %v1839_v2 }
 0x249   : > { %v1841_v9 = vpack.c.bf16 %v846_v7, %v846_v7  ;;  %v1842_v12 = vpack.c.bf16 %v847_v8, %v847_v8 }
 0x24b   : > { %1769 = vmatprep.subr.msk.bf16.mxu1 %vm922_vm9, %v1842_v12  ;;  %v924_v13 = vsel %vm922_vm9, %v1841_v9, 0 }
 0x24c   : > { %938 = vmatpush1.bf16.msra.mxu1 %v924_v13 }
 0x24f   : > { %1770 = vmatmul.mubr.msk.bf16.vlgmr.msra.gmra.mrb[0].mxu1 %vm918_vm10, %v857_v16 }
 0x250   : > { %1132 = vmatprep.mubr.bf16.mxu1 %v2020_v0 }
 0x255   : > { %v871_v17 = vpop.permute.xlu1 %870 }
 0x256   : > { %v985_v42 = vpop.permute.xlu0 %984 }
 0x259   : > { %v990_v39 = vpop.permute.xlu1 %989 }
 0x25a   : > { %v995_v3 = vpop.permute.xlu0 %994 }
 0x322   : > { %v963_v18 = vpop.f32.mrb[0].mxu1 }
 0x323   : > { %v964_v20 = vadd.f32 %v963_v18, %v871_v17  ;;  %v965_v24 = vpop.f32.mrb[1].mxu1 }
 0x324   : > { %v966_v25 = vadd.f32 %v965_v24, %v871_v17  ;;  %v967_v30 = vpop.f32.mrb[2].mxu1 }
 0x325   : > { %v970_v31 = vmax.f32 %v964_v20, 0.0  ;;  %v968_v32 = vpop.f32.mrb[3].mxu1 }
 0x326   : > { %v971_v33 = vmax.f32 %v966_v25, 0.0 }
 0x327   : > { %v976_v34 = vpack.c.bf16 %v970_v31, %v970_v31 }
 0x328   : > { %v977_v35 = vpack.c.bf16 %v971_v33, %v971_v33 }
 0x329   : > { %v1020_v36 = vsel %vm922_vm9, %v976_v34, 0 }
 0x32a   : > { %1773 = vmatprep.subr.msk.bf16.mxu0 %vm922_vm9, %v977_v35  ;;  %v1314_v35 = vld [vmem:[%s2749_s12] sm:$0xff] }
 0x32b   : > { %1026 = vmatpush1.bf16.msra.mxu0 %v1020_v36  ;;  %v1423_v36 = vld [vmem:[%s2751_s14] sm:$0xff] }
 0x32e   : > { %1774 = vmatmul.mubr.msk.bf16.vlgmr.msra.gmra.mrb[4].mxu0 %vm1012_vm11, %v1913_v38  ;;  %v1424_v38 = vld [vmem:[%s2751_s14 + $0x8] sm:$0xff] }
 0x32f   : > { %1067 = vmatprep.mubr.bf16.mxu0 %v2020_v0 }
 0x336   : > { %1775 = vmatmul.mubr.msk.bf16.gmra.mrb[8].mxu0 %vm1012_vm11, %v1914_v40  ;;  %v1425_v40 = vld [vmem:[%s2751_s14 + $0x10] sm:$0xff] }
 0x337   : > { %1406 = vmatprep.mubr.bf16.mxu0 %v2020_v0 }
 0x401   : > { %v1059_v41 = vpop.f32.mrb[4].mxu0 }
 0x402   : > { %v1061_v45 = vpop.f32.mrb[5].mxu0  ;;  %v1060_v51 = vadd.f32 %v1059_v41, %v985_v42  ;;  %v1426_v41 = vld [vmem:[%s2751_s14 + $0x18] sm:$0xff] }
 0x403   : > { %v1062_v37 = vadd.f32 %v1061_v45, %v985_v42  ;;  %v1063_v49 = vpop.f32.mrb[6].mxu0  ;;  %v1538_v42 = vld [vmem:[%s2753_s16] sm:$0xff]  ;;  %v1539_v45 = vld [vmem:[%s2753_s16 + $0x8] sm:$0xff] }
 0x404   : > { %v1064_v52 = vadd.f32 %v1063_v49, %v990_v39  ;;  %v1065_v53 = vpop.f32.mrb[7].mxu0  ;;  %v2509_v63 = vadd.f32 %v1060_v51, %v2257_v15 }
 0x405   : > { %v1066_v57 = vadd.f32 %v1065_v53, %v990_v39  ;;  %v2503_v59 = vadd.f32 %v1062_v37, %v2260_v19  ;;  %v1540_v39 = vld [vmem:[%s2753_s16 + $0x10] sm:$0xff]  ;;  %v1541_v37 = vld [vmem:[%s2753_s16 + $0x18] sm:$0xff] }
 0x406   : > { %v2500_v58 = vadd.f32 %v1064_v52, %v2265_v22  ;;  %v1000_v22 = vpop.permute.xlu1 %999 }
 0x407   : > { %v2506_v60 = vadd.f32 %v1066_v57, %v2267_v23 }
 0x408   : > { %v1087_v4 = vpack.c.bf16 %v2500_v58, %v2509_v63 }
 0x409   : > { %v1069_v1 = vpop.f32.mrb[8].mxu0  ;;  %v1088_v2 = vpack.c.bf16 %v2506_v60, %v2503_v59 }
 0x40a   : > { %v1071_v7 = vpop.f32.mrb[9].mxu0  ;;  %v1070_v19 = vadd.f32 %v1069_v1, %v995_v3 }
 0x40b   : > { %v1072_v8 = vadd.f32 %v1071_v7, %v995_v3  ;;  %v1073_v9 = vpop.f32.mrb[10].mxu0  ;;  %1100 = vmatprep.subr.bf16.mxu1 %v1088_v2 }
 0x40c   : > { %v1074_v12 = vadd.f32 %v1073_v9, %v1000_v22  ;;  %v1075_v23 = vpop.f32.mrb[11].mxu0  ;;  %1101 = vmatpush1.bf16.msra.mxu1 %v1087_v4  ;;  %v2525_v18 = vadd.f32 %v1070_v19, %v2273_v26 }
 0x40d   : > { %v1076_v13 = vadd.f32 %v1075_v23, %v1000_v22  ;;  %v2519_v16 = vadd.f32 %v1072_v8, %v2255_v14  ;;  %v1095_v14 = vpop.permute.xlu0 %1094 }
 0x40e   : > { %v2516_v15 = vadd.f32 %v1074_v12, %v2275_v27  ;;  %v1086_v27 = vld [vmem:[%s2746_s9] sm:$0xf] }
 0x40f   : > { %v2522_v17 = vadd.f32 %v1076_v13, %v2263_v21 }
 0x410   : > { %v1089_v24 = vpack.c.bf16 %v2516_v15, %v2525_v18 }
 0x411   : > { %v1090_v20 = vpack.c.bf16 %v2522_v17, %v2519_v16 }
 0x413   : > { %1102 = vmatprep.subr.bf16.mxu1 %v1090_v20 }
 0x414   : > { %1103 = vmatpush1.bf16.msra.mxu1 %v1089_v24 }
 0x417   : > { %1776 = vmatmul.mubr.msk.bf16.vlgmr.msra.gmra.mrb[4].mxu1 %vm639_vm0, %v1086_v27 }
 0x418   : > { %1501 = vmatprep.mubr.bf16.mxu1 %v2020_v0 }
 0x4ea   : > { %v1134_v21 = vpop.f32.mrb[4].mxu1 }
 0x4eb   : > { %v1135_v26 = vadd.f32 %v1134_v21, %v1095_v14  ;;  %v1136_v25 = vpop.f32.mrb[5].mxu1 }
 0x4ec   : > { %v1137_v30 = vadd.f32 %v1136_v25, %v1095_v14  ;;  %v1138_v31 = vpop.f32.mrb[6].mxu1 }
 0x4ed   : > { %v2536_v32 = vmax.f32 %v1135_v26, 0.0  ;;  %v1139_v33 = vpop.f32.mrb[7].mxu1 }
 0x4ee   : > { %v2538_v34 = vmax.f32 %v1137_v30, 0.0 }
 0x4ef   : > { %1143 = vrot.lane.b32.xlu1 %v2536_v32, %s2021_s29 }
 0x4f0   : > { %1145 = vrot.lane.b32.xlu0 %v2538_v34, %s2021_s29  ;;  %s2805_s29 = smov 113  }
 0x4f3   : > { %1162 = vrot.lane.b32.xlu1 %v2536_v32, %s2779_s13 }
 0x4f4   : > { %1164 = vrot.lane.b32.xlu0 %v2538_v34, %s2779_s13  ;;  %s2029_s13 = smov [#allocation6]  }
 0x4f5   : > { %s1953_s2 = sshll.u32 %s2029_s13, 4  ;;  %s1954_s2 = int_to_ptr.vmem [resolvable:$false] %s1953_s2 }
 0x4f6   : > { %s1955_s3 = scalar_lea.vmem %s1954_s2, 2048 }
 0x4f7   : > { %1181 = vrot.lane.b32.xlu1 %v2536_v32, %s2802_s18 }
 0x4f8   : > { %1183 = vrot.lane.b32.xlu0 %v2538_v34, %s2802_s18 }
 0x4fb   : > { %1200 = vrot.lane.b32.xlu1 %v2536_v32, %s2803_s26 }
 0x4fc   : > { %1202 = vrot.lane.b32.xlu0 %v2538_v34, %s2803_s26  ;;  %s2810_s26 = sld [smem:[#allocation19_spill]] }
 0x4ff   : > { %1228 = vrot.lane.b32.xlu1 %v2536_v32, %s2804_s15 }
 0x500   : > { %1230 = vrot.lane.b32.xlu0 %v2538_v34, %s2804_s15 }
 0x502   : > { %s2811_s15 = smov %s2810_s26 }
 0x503   : > { %1247 = vrot.lane.b32.xlu1 %v2536_v32, %s2805_s29 }
 0x504   : > { %1249 = vrot.lane.b32.xlu0 %v2538_v34, %s2805_s29  ;;  %s2814_s29 = sld [smem:[#allocation20_spill]] }
 0x507   : > { %1266 = vrot.lane.b32.xlu1 %v2536_v32, %s2806_s21 }
 0x508   : > { %1268 = vrot.lane.b32.xlu0 %v2538_v34, %s2806_s21 }
 0x50a   : > { %s2692_s21 = scalar_lea.hbm %s2814_s29, %s1832_s0 }
 0x50b   : > { %1285 = vrot.lane.b32.xlu1 %v2536_v32, %s2807_s20 }
 0x50c   : > { %1287 = vrot.lane.b32.xlu0 %v2538_v34, %s2807_s20  ;;  %s2812_s20 = sshll.u32 %s2225_s30, 6 }
 0x50f   : > { %1317 = vperm.xlu1 %1912, %v1314_v35  }
 0x510   : > { %1429 = vperm.xlu0 %1911, %v1423_v36  }
 0x513   : > { %1434 = vperm.xlu1 %1912, %v1424_v38  }
 0x514   : > { %1439 = vperm.xlu0 %1911, %v1425_v40  }
 0x517   : > { %1444 = vperm.xlu1 %1912, %v1426_v41  }
 0x518   : > { %1544 = vperm.xlu0 %1911, %v1538_v42  }
 0x51b   : > { %1549 = vperm.xlu1 %1912, %v1539_v45  }
 0x51c   : > { %1554 = vperm.xlu0 %1911, %v1540_v39  }
 0x51f   : > { %1559 = vperm.xlu1 %1912, %v1541_v37  }
 0x561   : > { %v1144_v49 = vpop.permute.xlu1 %1143 }
 0x562   : > { %v1146_v51 = vpop.permute.xlu0 %1145 }
 0x563   : > { %v1147_v52 = vsel %vm692_vm1, %v1144_v49, %v1146_v51  ;;  %v1148_v53 = vsel %vm692_vm1, %v1146_v51, %v1144_v49 }
 0x564   : > { %v1151_v4 = vmul.f32 %v1148_v53, %v2346_v50  ;;  %v1152_v7 = vmul.f32 %v1147_v52, %v2361_v55 }
 0x565   : > { %v1163_v57 = vpop.permute.xlu1 %1162 }
 0x566   : > { %v1165_v1 = vpop.permute.xlu0 %1164 }
 0x567   : > { %v1166_v2 = vsel %vm712_vm2, %v1163_v57, %v1165_v1  ;;  %v1167_v3 = vsel %vm712_vm2, %v1165_v1, %v1163_v57 }
 0x568   : > { %v1170_v22 = vmul.f32 %v1167_v3, %v2356_v54  ;;  %v1171_v8 = vmul.f32 %v1166_v2, %v2366_v56  ;;  %v1304_v3 = vld [vmem:[%s2748_s11] sm:$0xf] }
 0x569   : > { %v1182_v9 = vpop.permute.xlu1 %1181 }
 0x56a   : > { %v1843_v19 = vpack.c.bf16 %v1170_v22, %v1151_v4  ;;  %v1184_v12 = vpop.permute.xlu0 %1183  ;;  %v1844_v23 = vpack.c.bf16 %v1171_v8, %v1152_v7 }
 0x56b   : > { %v1185_v13 = vsel %vm732_vm3, %v1182_v9, %v1184_v12  ;;  %v1186_v20 = vsel %vm732_vm3, %v1184_v12, %v1182_v9 }
 0x56c   : > { %1374 = vmatprep.subr.bf16.mxu0 %v1844_v23  ;;  %v1189_v56 = vmul.f32 %v1186_v20, %v2380_v5  ;;  %v1190_v27 = vmul.f32 %v1185_v13, %v2386_v6  ;;  %v1915_v20 = vld [vmem:[%s2808_s24] sm:$0xff]   ;;  %s581_s24 = scalar_lea.vmem [#allocation6], %s2812_s20 }
 0x56d   : > { %1375 = vmatpush1.bf16.msra.mxu0 %v1843_v19  ;;  %v1201_v24 = vpop.permute.xlu1 %1200  ;;  %s1653_s23 = sshll.u32 %s581_s24, 4  ;;  %s2687_s23 = int_to_ptr.vmem [resolvable:$true] %s1653_s23 }
 0x56e   : > { %v1203_v50 = vpop.permute.xlu0 %1202  ;;  %s1949_s20 = scalar_lea.vmem %s2687_s23, 1024  ;;  %p1956_p10 = scmp.lt.s32.totalorder %s2687_s23, %s1954_s2 }
 0x56f   : > { %v1204_v55 = vsel %vm752_vm4, %v1201_v24, %v1203_v50  ;;  %v1205_v54 = vsel %vm752_vm4, %v1203_v50, %v1201_v24  ;;  %v1916_v24 = vld [vmem:[%s2809_s19 + $0x8] sm:$0xff]   ;;  %p1950_p6 = scmp.ne.s32.totalorder %s2687_s23, %s1949_s20  ;;  %p1957_p0 = scmp.lt.s32.totalorder %s1955_s3, %s1949_s20 }
 0x570   : > { %v1208_v14 = vmul.f32 %v1205_v54, %v2395_v10  ;;  %v1209_v21 = vmul.f32 %v1204_v55, %v2400_v11 }
 0x571   : > { %v1229_v26 = vpop.permute.xlu1 %1228  ;;  %p1951_p13 = pnand %p1950_p6, %p2815_p12  ;;  %p1958_p2 = por %p1957_p0, %p1956_p10 }
 0x572   : > { %v1845_v25 = vpack.c.bf16 %v1208_v14, %v1189_v56  ;;  %v1231_v30 = vpop.permute.xlu0 %1230  ;;  %v1846_v31 = vpack.c.bf16 %v1209_v21, %v1190_v27 }
 0x573   : > { %v1232_v33 = vsel %vm781_vm5, %v1229_v26, %v1231_v30  ;;  %v1233_v35 = vsel %vm781_vm5, %v1231_v30, %v1229_v26  ;;  %p1952_p8 = pneg %p1951_p13 }
 0x574   : > { %v1236_v36 = vmul.f32 %v1232_v33, %v2414_v28  ;;  %v1237_v5 = vmul.f32 %v1233_v35, %v2419_v29  ;;  %1376 = vmatprep.subr.bf16.mxu0 %v1846_v31 }
 0x575   : > { %1377 = vmatpush1.bf16.msra.mxu0 %v1845_v25  ;;  %v1248_v6 = vpop.permute.xlu1 %1247  ;;  %p1959_p4 = pnand %p1958_p2, %p1952_p8 }
 0x576   : > { %v1847_v10 = vpack.c.bf16 %v1236_v36, %v2536_v32  ;;  %v1250_v11 = vpop.permute.xlu0 %1249  ;;  %v1848_v38 = vpack.c.bf16 %v1237_v5, %v2538_v34 }
 0x577   : > { %v1251_v40 = vsel %vm801_vm6, %v1248_v6, %v1250_v11  ;;  %v1252_v41 = vsel %vm801_vm6, %v1250_v11, %v1248_v6 }
 0x578   : > { %1378 = vmatprep.subr.bf16.mxu0 %v1848_v38  ;;  %v1255_v32 = vmul.f32 %v1251_v40, %v2433_v43  ;;  %v1256_v34 = vmul.f32 %v1252_v41, %v2439_v44 }
 0x579   : > { %1379 = vmatpush1.bf16.msra.mxu0 %v1847_v10  ;;  %v1267_v42 = vpop.permute.xlu1 %1266 }
 0x57a   : > { %v1269_v28 = vpop.permute.xlu0 %1268 }
 0x57b   : > { %v1270_v29 = vsel %vm821_vm7, %v1267_v42, %v1269_v28  ;;  %v1271_v45 = vsel %vm821_vm7, %v1269_v28, %v1267_v42 }
 0x57c   : > { %v1274_v39 = vmul.f32 %v1270_v29, %v2448_v46  ;;  %v1275_v37 = vmul.f32 %v1271_v45, %v2453_v48 }
 0x57d   : > { %v1286_v49 = vpop.permute.xlu1 %1285 }
 0x57e   : > { %v1849_v51 = vpack.c.bf16 %v1274_v39, %v1255_v32  ;;  %v1288_v52 = vpop.permute.xlu0 %1287  ;;  %v1850_v53 = vpack.c.bf16 %v1275_v37, %v1256_v34  ;;  %v1917_v37 = vld [vmem:[%s2810_s26] sm:$0xff]  }
 0x57f   : > { %v1289_v57 = vsel %vm841_vm8, %v1286_v49, %v1288_v52  ;;  %v1290_v1 = vsel %vm841_vm8, %v1288_v52, %v1286_v49 }
 0x580   : > { %v1293_v2 = vmul.f32 %v1289_v57, %v2467_v61  ;;  %v1294_v43 = vmul.f32 %v1290_v1, %v2472_v62  ;;  %1380 = vmatprep.subr.bf16.mxu0 %v1850_v53 }
 0x581   : > { %1381 = vmatpush1.bf16.msra.mxu0 %v1849_v51 }
 0x582   : > { %v1851_v44 = vpack.c.bf16 %v1293_v2, %v1293_v2  ;;  %v1852_v46 = vpack.c.bf16 %v1294_v43, %v1294_v43 }
 0x584   : > { %1796 = vmatprep.subr.msk.bf16.mxu0 %vm922_vm9, %v1852_v46  ;;  %v1369_v48 = vsel %vm922_vm9, %v1851_v44, 0 }
 0x585   : > { %1383 = vmatpush1.bf16.msra.mxu0 %v1369_v48 }
 0x588   : > { %1797 = vmatmul.mubr.msk.bf16.vlgmr.msra.gmra.mrb[12].mxu0 %vm918_vm10, %v1304_v3 }
 0x589   : > { %1610 = vmatprep.mubr.bf16.mxu0 %v2020_v0 }
 0x58e   : > { %v1318_v47 = vpop.permute.xlu1 %1317 }
 0x58f   : > { %v1430_v50 = vpop.permute.xlu0 %1429 }
 0x592   : > { %v1435_v27 = vpop.permute.xlu1 %1434 }
 0x593   : > { %v1440_v6 = vpop.permute.xlu0 %1439 }
 0x596   : > { %v1445_v41 = vpop.permute.xlu1 %1444 }
 0x59a   : > { %v1550_v51 = vpop.permute.xlu1 %1549 }
 0x59e   : > { %v1560_v48 = vpop.permute.xlu1 %1559 }
 0x65b   : > { %v1408_v61 = vpop.f32.mrb[12].mxu0 }
 0x65c   : > { %v1409_v62 = vadd.f32 %v1408_v61, %v1318_v47  ;;  %v1410_v4 = vpop.f32.mrb[13].mxu0 }
 0x65d   : > { %v1411_v7 = vadd.f32 %v1410_v4, %v1318_v47  ;;  %v1412_v22 = vpop.f32.mrb[14].mxu0 }
 0x65e   : > { %v1415_v8 = vmax.f32 %v1409_v62, 0.0  ;;  %v1413_v9 = vpop.f32.mrb[15].mxu0 }
 0x65f   : > { %v1416_v19 = vmax.f32 %v1411_v7, 0.0 }
 0x660   : > { %v1421_v12 = vpack.c.bf16 %v1415_v8, %v1415_v8 }
 0x661   : > { %v1422_v23 = vpack.c.bf16 %v1416_v19, %v1416_v19 }
 0x662   : > { %v1464_v13 = vsel %vm922_vm9, %v1421_v12, 0 }
 0x663   : > { %1800 = vmatprep.subr.msk.bf16.mxu1 %vm922_vm9, %v1422_v23 }
 0x664   : > { %1470 = vmatpush1.bf16.msra.mxu1 %v1464_v13 }
 0x667   : > { %1801 = vmatmul.mubr.msk.bf16.vlgmr.msra.gmra.mrb[8].mxu1 %vm1012_vm11, %v1915_v20 }
 0x668   : > { %1511 = vmatprep.mubr.bf16.mxu1 %v2020_v0 }
 0x66f   : > { %1802 = vmatmul.mubr.msk.bf16.gmra.mrb[12].mxu1 %vm1012_vm11, %v1916_v24 }
 0x73a   : > { %v1503_v55 = vpop.f32.mrb[8].mxu1 }
 0x73b   : > { %v1504_v54 = vadd.f32 %v1503_v55, %v1430_v50  ;;  %v1505_v56 = vpop.f32.mrb[9].mxu1 }
 0x73c   : > { %v1506_v14 = vadd.f32 %v1505_v56, %v1430_v50  ;;  %v1507_v21 = vpop.f32.mrb[10].mxu1 }
 0x73d   : > { %v1508_v26 = vadd.f32 %v1507_v21, %v1435_v27  ;;  %v1509_v25 = vpop.f32.mrb[11].mxu1  ;;  %v1522_v31 = vadd.f32 %v1504_v54, %v2509_v63 }
 0x73e   : > { %v1510_v30 = vadd.f32 %v1509_v25, %v1435_v27  ;;  %v1523_v35 = vadd.f32 %v1506_v14, %v2503_v59 }
 0x73f   : > { %v1524_v33 = vadd.f32 %v1508_v26, %v2500_v58 }
 0x740   : > { %v1525_v36 = vadd.f32 %v1510_v30, %v2506_v60 }
 0x741   : > { %v1534_v5 = vpack.c.bf16 %v1524_v33, %v1522_v31 }
 0x742   : > { %v1513_v10 = vpop.f32.mrb[12].mxu1  ;;  %v1535_v11 = vpack.c.bf16 %v1525_v36, %v1523_v35 }
 0x743   : > { %v1514_v38 = vadd.f32 %v1513_v10, %v1440_v6  ;;  %v1515_v40 = vpop.f32.mrb[13].mxu1 }
 0x744   : > { %v1516_v42 = vadd.f32 %v1515_v40, %v1440_v6  ;;  %v1517_v28 = vpop.f32.mrb[14].mxu1  ;;  %1578 = vmatprep.subr.bf16.mxu0 %v1535_v11 }
 0x745   : > { %v1518_v29 = vadd.f32 %v1517_v28, %v1445_v41  ;;  %v1519_v45 = vpop.f32.mrb[15].mxu1  ;;  %1579 = vmatpush1.bf16.msra.mxu0 %v1534_v5  ;;  %v1526_v58 = vadd.f32 %v1514_v38, %v2525_v18 }
 0x746   : > { %v1520_v63 = vadd.f32 %v1519_v45, %v1445_v41  ;;  %v1527_v60 = vadd.f32 %v1516_v42, %v2519_v16  ;;  %v1545_v16 = vpop.permute.xlu0 %1544 }
 0x747   : > { %v1528_v59 = vadd.f32 %v1518_v29, %v2516_v15  ;;  %v1918_v15 = vld [vmem:[%s2811_s15 + $0x8] sm:$0xff]  }
 0x748   : > { %v1529_v32 = vadd.f32 %v1520_v63, %v2522_v17 }
 0x749   : > { %v1536_v34 = vpack.c.bf16 %v1528_v59, %v1526_v58 }
 0x74a   : > { %v1537_v39 = vpack.c.bf16 %v1529_v32, %v1527_v60  ;;  %v1555_v2 = vpop.permute.xlu0 %1554 }
 0x74c   : > { %1580 = vmatprep.subr.bf16.mxu0 %v1537_v39 }
 0x74d   : > { %1581 = vmatpush1.bf16.msra.mxu0 %v1536_v34 }
 0x750   : > { %1805 = vmatmul.mubr.msk.bf16.vlgmr.msra.gmra.mrb[16].mxu0 %vm639_vm0, %v1917_v37 }
 0x751   : > { %1620 = vmatprep.mubr.bf16.mxu0 %v2020_v0 }
 0x758   : > { %1806 = vmatmul.mubr.msk.bf16.gmra.mrb[20].mxu0 %vm639_vm0, %v1918_v15 }
 0x823   : > { %v1612_v17 = vpop.f32.mrb[16].mxu0 }
 0x824   : > { %v1613_v18 = vadd.f32 %v1612_v17, %v1545_v16  ;;  %v1614_v49 = vpop.f32.mrb[17].mxu0 }
 0x825   : > { %v1615_v52 = vadd.f32 %v1614_v49, %v1545_v16  ;;  %v1616_v53 = vpop.f32.mrb[18].mxu0 }
 0x826   : > { %1631 = vst [vmem:[%s581_s24] sm:$0xff] %v1613_v18  ;;  %v1617_v57 = vadd.f32 %v1616_v53, %v1550_v51  ;;  %v1618_v1 = vpop.f32.mrb[19].mxu0 }
 0x827   : > { %1632 = vst [vmem:[%s581_s24 + $0x8] sm:$0xff] %v1615_v52  ;;  %v1619_v0 = vadd.f32 %v1618_v1, %v1550_v51 }
 0x828   : > { %1633 = vst [vmem:[%s581_s24 + $0x10] sm:$0xff] %v1617_v57 }
 0x829   : > { %1634 = vst [vmem:[%s581_s24 + $0x18] sm:$0xff] %v1619_v0 }
 0x82b   : > { %v1622_v43 = vpop.f32.mrb[20].mxu0 }
 0x82c   : > { %v1623_v44 = vadd.f32 %v1622_v43, %v1555_v2  ;;  %v1624_v46 = vpop.f32.mrb[21].mxu0 }
 0x82d   : > { %v1625_v3 = vadd.f32 %v1624_v46, %v1555_v2  ;;  %v1626_v47 = vpop.f32.mrb[22].mxu0 }
 0x82e   : > { %1635 = vst [vmem:[%s581_s24 + $0x20] sm:$0xff] %v1623_v44  ;;  %v1627_v61 = vadd.f32 %v1626_v47, %v1560_v48  ;;  %v1628_v62 = vpop.f32.mrb[23].mxu0 }
 0x82f   : > { %1636 = vst [vmem:[%s581_s24 + $0x28] sm:$0xff] %v1625_v3  ;;  %v1629_v4 = vadd.f32 %v1628_v62, %v1560_v48 }
 0x830   : > { %1637 = vst [vmem:[%s581_s24 + $0x30] sm:$0xff] %v1627_v61 }
 0x831   : > { %1638 = vst [vmem:[%s581_s24 + $0x38] sm:$0xff] %v1629_v4 }
 0x832   : > { %1962 = shalt.err (!%p1959_p4)
}
 0x833   : > { %s1963_s24 = scalar_lea.hbm %s2692_s21, 1024  ;;  %s1967_s13 = scalar_lea.hbm %s2814_s29, 2048 }
 0x834   : > { %p1964_p5 = scmp.ne.s32.totalorder %s2692_s21, %s1963_s24  ;;  %p1968_p1 = scmp.lt.u32.totalorder %s2692_s21, %s2814_s29 }
 0x835   : > { %p1969_p3 = scmp.lt.u32.totalorder %s1967_s13, %s1963_s24  ;;  %p1971_p6 = scmp.lt.u32.totalorder %s1963_s24, %s2692_s21 }
 0x836   : > { %p1965_p7 = pnand %p1964_p5, %p2815_p12 }
 0x837   : > { %p1970_p11 = por %p1969_p3, %p1968_p1 }
 0x838   : > { %p1966_p9 = pneg %p1965_p7 }
 0x839   : > { %p1972_p13 = por %p1971_p6, %p1970_p11 }
 0x83b   : > { %p1973_p8 = pnand %p1972_p13, %p1966_p9 }
 0x83d   : > { %1976 = shalt.err (!%p1973_p8)
}
 0x83e   : > { %s2030_s3 = smov 256   ;;  %s2816_s20 = smov 16  }
 0x83f   : > { %1855 = dma.vmem_to_hbm [thread:$0]  (%p2815_p12), %s2687_s23, 1024, %s2692_s21, %s1640_s28, %s2030_s3, %s2030_s3, %s2816_s20  }
 0x840 PF: > { %s2817_s0 = sld [smem:[#allocation9_spill]]  ;;  %p2818_p10 = scmp.ne.s32.totalorder %s2795_s22, 0 }
 0x841   : > { %p2819_p0 = scmp.ge.s32.totalorder %s2015_s27, 2 }
 0x843   : > { %p1862_p2 = pnand %p2819_p0, %p2818_p10 }
 0x846   : > { %s1668_s18 = sand.u32 1, %s2817_s0  }
 0x847   : > { %s1669_s24 = scalar_lea.sflag [#allocation5], %s1668_s18 }
 0x848   : > { %1998 = dma.done.wait (!%p1862_p2), %s1669_s24, 1024  }
 0x849   : > { %2000 = vsyncadd (!%p1862_p2), %s1669_s24, 4294966272  ;;  %s2820_s27 = sld [smem:[#allocation11_spill]]  ;;  %s2821_s1 = sld [smem:[#allocation10_spill]] }
 0x84a   : > { %s2822_s26 = sld [smem:[#allocation12_spill]]  ;;  %s2823_s24 = smov %s2007_s25 }
 0x84f   : > { %p30_p4 = scmp.ge.s32.totalorder %s2820_s27, 4   ;;  %s2824_s25 = smov %s2821_s1 }
 0x851   :  { %32 = sbr.rel (!%p30_p4) target bundleno = 13 (0xd), region = 136 }
 0x858   :  { %1674 = vsyncpa [#allocation4], 1 }
 0x859   :  { %1676 = vsyncpa [#allocation4 + $0x1], 1 }
 0x85a   :  { %1677 = vsyncpa [#allocation5], 1 }
 0x85b   :  { %1679 = vsyncpa [#allocation5 + $0x1], 1 }

</bundles_post_ra>
